<compile_context>
chip_gen: v7x
topology: tpu7x:2x2x1
jax: 0.10.0
libtpu: 0.0.40
codegen_flags: <defaults>
</compile_context>

<pallas_src>
import functools

import jax
import jax.numpy as jnp
from jax import lax
from jax.experimental import pallas as pl
from jax.experimental.pallas import tpu as pltpu


def _round_up(x, m):
    return ((x + m - 1) // m) * m


def _ssi_partials_kernel(pred_ref, targ_ref, mask_ref, out_ref, *,
                         scales, h_valid, w_valid):
    """Per-image partial sums for the scale-and-shift-invariant loss.

    One block = one zero-padded (Hp, Wp) depth map.  Emits, per image:
      out[0, 0]               sum(mask * (pred_ssi - target)^2)       (MSE numerator)
      out[0, 1]               sum(mask)                               (MSE divisor / 2)
      out[0, 2 + s]           gradient-loss numerator at scale s
      out[0, 2 + scales + s]  gradient-loss divisor at scale s (subsampled mask sum)
    """
    f32 = jnp.float32
    pred = pred_ref[...].astype(f32)
    targ = targ_ref[...].astype(f32)
    mask = mask_ref[...].astype(f32)
    hp, wp = pred.shape

    # ---- normalized_depth_scale_and_shift: per-image 2x2 least squares ----------------
    mp = mask * pred
    a00 = jnp.sum(mp * pred, keepdims=True)      # (1, 1)
    a01 = jnp.sum(mp, keepdims=True)
    a11 = jnp.sum(mask, keepdims=True)
    b0 = jnp.sum(mp * targ, keepdims=True)
    b1 = jnp.sum(mask * targ, keepdims=True)

    det = a00 * a11 - a01 * a01
    ok = det != 0.0
    det_safe = jnp.where(ok, det, 1.0)
    scale = jnp.where(ok, (a11 * b0 - a01 * b1) / det_safe, 0.0)   # 0 where det == 0
    shift = jnp.where(ok, (-a01 * b0 + a00 * b1) / det_safe, 0.0)

    res = scale * pred + shift - targ            # (Hp, Wp)
    diff = mask * res

    # ---- MiDaSMSELoss partials ----------------------------------------------------------
    out_ref[:, 0:1] = jnp.sum(res * res * mask, keepdims=True)
    out_ref[:, 1:2] = a11                        # reused as MSE divisor (x2 in epilogue)

    # ---- GradientLoss partials (multiscale) ----------------------------------------------
    row = lax.broadcasted_iota(jnp.int32, (hp, wp), 0)
    col = lax.broadcasted_iota(jnp.int32, (hp, wp), 1)

    for s in range(scales):
        step = 1 << s
        rowsel = (row & (step - 1)) == 0         # row on the ::step subgrid
        colsel = (col & (step - 1)) == 0         # col on the ::step subgrid

        # x direction: pair each on-grid column with the next on-grid column via a
        # full-width lane rotation (XLU) instead of unaligned lane slices.  Rolling the
        # iota with the data makes the pairing robust to the rotate direction and
        # excludes wrap-around pairs (and anything touching padding / off-grid columns).
        shift_x = (wp - step) % wp
        diff_rx = pltpu.roll(diff, shift_x, 1)
        mask_rx = pltpu.roll(mask, shift_x, 1)
        col_rx = pltpu.roll(col, shift_x, 1)
        lo_x = jnp.minimum(col, col_rx)
        hi_x = jnp.maximum(col, col_rx)
        sel_x = ((hi_x - lo_x) == step) & ((lo_x & (step - 1)) == 0) \
            & (hi_x < w_valid) & rowsel
        wx = mask * mask_rx * sel_x.astype(f32)  # fused per-scale weight
        gx = jnp.sum(jnp.abs(diff_rx - diff) * wx, keepdims=True)

        # y direction: same trick along sublanes.
        shift_y = (hp - step) % hp
        diff_ry = pltpu.roll(diff, shift_y, 0)
        mask_ry = pltpu.roll(mask, shift_y, 0)
        row_ry = pltpu.roll(row, shift_y, 0)
        lo_y = jnp.minimum(row, row_ry)
        hi_y = jnp.maximum(row, row_ry)
        sel_y = ((hi_y - lo_y) == step) & ((lo_y & (step - 1)) == 0) \
            & (hi_y < h_valid) & colsel
        wy = mask * mask_ry * sel_y.astype(f32)
        gy = jnp.sum(jnp.abs(diff_ry - diff) * wy, keepdims=True)

        on_grid = (rowsel & colsel).astype(f32)
        gden = jnp.sum(mask * on_grid, keepdims=True)

        out_ref[:, 2 + s:3 + s] = gx + gy
        out_ref[:, 2 + scales + s:3 + scales + s] = gden


def scale_and_shift_invariant_loss(prediction, target, mask, *, alpha=0.5, scales=4):
    """Pallas TPU forward of nerfstudio's ScaleAndShiftInvariantLoss ("batch" reduction)."""
    b, h, w = prediction.shape
    if mask.dtype == jnp.bool_:
        mask = mask.astype(prediction.dtype)

    # Lane-dense zero padding (semantics preserved: every reduced term is mask-weighted).
    hp = _round_up(h, 8)
    wp = _round_up(w, 128)
    steps = [1 << s for s in range(scales)]
    while any(hp == 2 * st for st in steps):     # avoid |wrap| == step aliasing in the pairer
        hp += 8
    while any(wp == 2 * st for st in steps):
        wp += 128
    pad = ((0, 0), (0, hp - h), (0, wp - w))
    pred_p = jnp.pad(prediction, pad)
    targ_p = jnp.pad(target, pad)
    mask_p = jnp.pad(mask, pad)

    n_out = 2 + 2 * scales
    kernel = functools.partial(_ssi_partials_kernel, scales=scales, h_valid=h, w_valid=w)

    in_itemsize = (pred_p.dtype.itemsize + targ_p.dtype.itemsize + mask_p.dtype.itemsize)
    # Double-buffered inputs + generous f32 temporaries for one image block.
    est_bytes = 2 * hp * wp * in_itemsize + 20 * hp * wp * 4
    vmem_limit = int(min(48 * 2**20, max(16 * 2**20, est_bytes)))
    cost = pl.CostEstimate(
        flops=int(b * hp * wp * (16 + 20 * scales)),
        transcendentals=0,
        bytes_accessed=int(b * hp * wp * in_itemsize + b * n_out * 4),
    )

    partials = pl.pallas_call(
        kernel,
        out_shape=jax.ShapeDtypeStruct((b, 1, n_out), jnp.float32),
        grid=(b,),
        in_specs=[
            pl.BlockSpec((None, hp, wp), lambda i: (i, 0, 0)),
            pl.BlockSpec((None, hp, wp), lambda i: (i, 0, 0)),
            pl.BlockSpec((None, hp, wp), lambda i: (i, 0, 0)),
        ],
        out_specs=pl.BlockSpec((None, 1, n_out), lambda i: (i, 0, 0)),
        compiler_params=pltpu.CompilerParams(
            dimension_semantics=("parallel",),
            vmem_limit_bytes=vmem_limit,
        ),
        cost_estimate=cost,
    )(pred_p, targ_p, mask_p)

    # Tiny JAX epilogue: batch reduction + guarded divides ("batch" reduction semantics).
    tot = jnp.sum(partials[:, 0, :], axis=0)     # (n_out,)

    def safe_div(num, den):
        nz = den != 0.0
        return jnp.where(nz, num / jnp.where(nz, den, 1.0), 0.0)

    data_loss = safe_div(tot[0], 2.0 * tot[1])
    reg_loss = 0.0
    for s in range(scales):
        reg_loss = reg_loss + safe_div(tot[2 + s], tot[2 + scales + s])
    return data_loss + alpha * reg_loss


def _reference(pred, targ, mask, alpha=0.5, scales=4):
    """Plain-JAX mirror of the PyTorch module for verification."""
    def sums(x):
        return jnp.sum(x, axis=(1, 2))

    a00, a01, a11 = sums(mask * pred * pred), sums(mask * pred), sums(mask)
    b0, b1 = sums(mask * pred * targ), sums(mask * targ)
    det = a00 * a11 - a01 * a01
    valid = det != 0
    det_s = jnp.where(valid, det, 1.0)
    scale = jnp.where(valid, (a11 * b0 - a01 * b1) / det_s, 0.0)
    shift = jnp.where(valid, (-a01 * b0 + a00 * b1) / det_s, 0.0)
    pred_ssi = scale[:, None, None] * pred + shift[:, None, None]
    res = pred_ssi - targ
    data = jnp.sum(res * res * mask) / (2.0 * jnp.sum(mask))
    diff = mask * res
    reg = 0.0
    for s in range(scales):
        st = 2 ** s
        p, m = diff[:, ::st, ::st], mask[:, ::st, ::st]
        gx = jnp.abs(p[:, :, 1:] - p[:, :, :-1]) * m[:, :, 1:] * m[:, :, :-1]
        gy = jnp.abs(p[:, 1:, :] - p[:, :-1, :]) * m[:, 1:, :] * m[:, :-1, :]
        reg = reg + (jnp.sum(gx) + jnp.sum(gy)) / jnp.sum(m)
    return data + alpha * reg


if __name__ == "__main__":
    B, H, W = 2, 32, 32
    key = jax.random.PRNGKey(0)
    k1, k2, k3 = jax.random.split(key, 3)
    prediction = jax.random.uniform(k1, (B, H, W), jnp.float32, 0.1, 2.0)
    target = jax.random.uniform(k2, (B, H, W), jnp.float32, 0.1, 1.0)
    mask = (jax.random.uniform(k3, (B, H, W)) > 0.2).astype(jnp.float32)

    out = scale_and_shift_invariant_loss(prediction, target, mask, alpha=0.5, scales=4)
    out = jax.block_until_ready(out)

    ref = jax.block_until_ready(_reference(prediction, target, mask))
    assert abs(float(out) - float(ref)) <= 1e-4 * max(1.0, abs(float(ref))), (out, ref)

    print("KERNEL_OK")
</pallas_src>

<mosaic_0001>
module attributes {stable_mosaic.version = 11 : i64} {
  func.func @_ssi_partials_kernel(%arg0: i32, %arg1: memref<1x32x128xf32, #tpu.memory_space<vmem>>, %arg2: memref<1x32x128xf32, #tpu.memory_space<vmem>>, %arg3: memref<1x32x128xf32, #tpu.memory_space<vmem>>, %arg4: memref<1x1x10xf32, #tpu.memory_space<vmem>>) attributes {dimension_semantics = [#tpu.dimension_semantics<parallel>], iteration_bounds = array<i64: 2>, scalar_prefetch = 0 : i64, scratch_operands = 0 : i64, tpu.core_type = #tpu.core_type<tc>, window_params = [{transform_indices = @transform_0, window_bounds = array<i64: 1, 32, 128>}, {transform_indices = @transform_1, window_bounds = array<i64: 1, 32, 128>}, {transform_indices = @transform_2, window_bounds = array<i64: 1, 32, 128>}, {transform_indices = @transform_3, window_bounds = array<i64: 1, 1, 10>}]} {
    %c0 = arith.constant 0 : index
    %c0_0 = arith.constant 0 : index
    %c0_1 = arith.constant 0 : index
    %0 = vector.load %arg1[%c0, %c0_0, %c0_1] : memref<1x32x128xf32, #tpu.memory_space<vmem>>, vector<1x32x128xf32>
    %1 = vector.shape_cast %0 : vector<1x32x128xf32> to vector<32x128xf32>
    %c0_2 = arith.constant 0 : index
    %c0_3 = arith.constant 0 : index
    %c0_4 = arith.constant 0 : index
    %2 = vector.load %arg2[%c0_2, %c0_3, %c0_4] : memref<1x32x128xf32, #tpu.memory_space<vmem>>, vector<1x32x128xf32>
    %3 = vector.shape_cast %2 : vector<1x32x128xf32> to vector<32x128xf32>
    %c0_5 = arith.constant 0 : index
    %c0_6 = arith.constant 0 : index
    %c0_7 = arith.constant 0 : index
    %4 = vector.load %arg3[%c0_5, %c0_6, %c0_7] : memref<1x32x128xf32, #tpu.memory_space<vmem>>, vector<1x32x128xf32>
    %5 = vector.shape_cast %4 : vector<1x32x128xf32> to vector<32x128xf32>
    %6 = arith.mulf %5, %1 : vector<32x128xf32>
    %7 = arith.mulf %6, %1 : vector<32x128xf32>
    %8 = vector.shape_cast %7 : vector<32x128xf32> to vector<1x32x128xf32>
    %cst = arith.constant dense<0.000000e+00> : vector<1xf32>
    %9 = vector.multi_reduction <add>, %8, %cst [1, 2] : vector<1x32x128xf32> to vector<1xf32>
    %10 = vector.shape_cast %9 : vector<1xf32> to vector<1x1x1xf32>
    %11 = vector.extract %10[0, 0, 0] : f32 from vector<1x1x1xf32>
    %12 = vector.broadcast %11 : f32 to vector<1x1xf32>
    %13 = vector.shape_cast %6 : vector<32x128xf32> to vector<1x32x128xf32>
    %cst_8 = arith.constant dense<0.000000e+00> : vector<1xf32>
    %14 = vector.multi_reduction <add>, %13, %cst_8 [1, 2] : vector<1x32x128xf32> to vector<1xf32>
    %15 = vector.shape_cast %14 : vector<1xf32> to vector<1x1x1xf32>
    %16 = vector.extract %15[0, 0, 0] : f32 from vector<1x1x1xf32>
    %17 = vector.broadcast %16 : f32 to vector<1x1xf32>
    %18 = vector.shape_cast %5 : vector<32x128xf32> to vector<1x32x128xf32>
    %cst_9 = arith.constant dense<0.000000e+00> : vector<1xf32>
    %19 = vector.multi_reduction <add>, %18, %cst_9 [1, 2] : vector<1x32x128xf32> to vector<1xf32>
    %20 = vector.shape_cast %19 : vector<1xf32> to vector<1x1x1xf32>
    %21 = vector.extract %20[0, 0, 0] : f32 from vector<1x1x1xf32>
    %22 = vector.broadcast %21 : f32 to vector<1x1xf32>
    %23 = arith.mulf %6, %3 : vector<32x128xf32>
    %24 = vector.shape_cast %23 : vector<32x128xf32> to vector<1x32x128xf32>
    %cst_10 = arith.constant dense<0.000000e+00> : vector<1xf32>
    %25 = vector.multi_reduction <add>, %24, %cst_10 [1, 2] : vector<1x32x128xf32> to vector<1xf32>
    %26 = vector.shape_cast %25 : vector<1xf32> to vector<1x1x1xf32>
    %27 = vector.extract %26[0, 0, 0] : f32 from vector<1x1x1xf32>
    %28 = vector.broadcast %27 : f32 to vector<1x1xf32>
    %29 = arith.mulf %5, %3 : vector<32x128xf32>
    %30 = vector.shape_cast %29 : vector<32x128xf32> to vector<1x32x128xf32>
    %cst_11 = arith.constant dense<0.000000e+00> : vector<1xf32>
    %31 = vector.multi_reduction <add>, %30, %cst_11 [1, 2] : vector<1x32x128xf32> to vector<1xf32>
    %32 = vector.shape_cast %31 : vector<1xf32> to vector<1x1x1xf32>
    %33 = vector.extract %32[0, 0, 0] : f32 from vector<1x1x1xf32>
    %34 = vector.broadcast %33 : f32 to vector<1x1xf32>
    %35 = arith.mulf %12, %22 : vector<1x1xf32>
    %36 = arith.mulf %17, %17 : vector<1x1xf32>
    %37 = arith.subf %35, %36 : vector<1x1xf32>
    %cst_12 = arith.constant 0.000000e+00 : f32
    %38 = vector.broadcast %cst_12 : f32 to vector<1x1xf32>
    %39 = arith.cmpf one, %37, %38 : vector<1x1xf32>
    %cst_13 = arith.constant 1.000000e+00 : f32
    %40 = vector.broadcast %cst_13 : f32 to vector<1x1xf32>
    %41 = arith.select %39, %37, %40 : vector<1x1xi1>, vector<1x1xf32>
    %42 = arith.mulf %22, %28 : vector<1x1xf32>
    %43 = arith.mulf %17, %34 : vector<1x1xf32>
    %44 = arith.subf %42, %43 : vector<1x1xf32>
    %45 = arith.divf %44, %41 : vector<1x1xf32>
    %cst_14 = arith.constant 0.000000e+00 : f32
    %46 = vector.broadcast %cst_14 : f32 to vector<1x1xf32>
    %47 = arith.select %39, %45, %46 : vector<1x1xi1>, vector<1x1xf32>
    %cst_15 = arith.constant 0.000000e+00 : f32
    %48 = vector.broadcast %cst_15 : f32 to vector<1x1xf32>
    %49 = arith.subf %48, %17 : vector<1x1xf32>
    %50 = arith.mulf %49, %28 : vector<1x1xf32>
    %51 = arith.mulf %12, %34 : vector<1x1xf32>
    %52 = arith.addf %50, %51 : vector<1x1xf32>
    %53 = arith.divf %52, %41 : vector<1x1xf32>
    %cst_16 = arith.constant 0.000000e+00 : f32
    %54 = vector.broadcast %cst_16 : f32 to vector<1x1xf32>
    %55 = arith.select %39, %53, %54 : vector<1x1xi1>, vector<1x1xf32>
    %56 = vector.broadcast %47 : vector<1x1xf32> to vector<32x128xf32>
    %57 = arith.mulf %56, %1 : vector<32x128xf32>
    %58 = vector.broadcast %55 : vector<1x1xf32> to vector<32x128xf32>
    %59 = arith.addf %57, %58 : vector<32x128xf32>
    %60 = arith.subf %59, %3 : vector<32x128xf32>
    %61 = arith.mulf %5, %60 : vector<32x128xf32>
    %62 = arith.mulf %60, %60 : vector<32x128xf32>
    %63 = arith.mulf %62, %5 : vector<32x128xf32>
    %64 = vector.shape_cast %63 : vector<32x128xf32> to vector<1x32x128xf32>
    %cst_17 = arith.constant dense<0.000000e+00> : vector<1xf32>
    %65 = vector.multi_reduction <add>, %64, %cst_17 [1, 2] : vector<1x32x128xf32> to vector<1xf32>
    %66 = vector.shape_cast %65 : vector<1xf32> to vector<1x1x1xf32>
    %67 = vector.extract %66[0, 0, 0] : f32 from vector<1x1x1xf32>
    %68 = vector.broadcast %67 : f32 to vector<1x1xf32>
    %c0_18 = arith.constant 0 : index
    %c0_19 = arith.constant 0 : index
    %c0_20 = arith.constant 0 : index
    %69 = vector.load %arg4[%c0_18, %c0_19, %c0_20] : memref<1x1x10xf32, #tpu.memory_space<vmem>>, vector<1x1x1xf32>
    %70 = vector.shape_cast %69 : vector<1x1x1xf32> to vector<1x1xf32>
    %71 = vector.shape_cast %68 : vector<1x1xf32> to vector<1x1x1xf32>
    tpu.vector_store %arg4[%c0_18, %c0_19, %c0_20], %71 {strides = array<i32>} : memref<1x1x10xf32, #tpu.memory_space<vmem>>, vector<1x1x1xf32>,
    %c0_21 = arith.constant 0 : index
    %c0_22 = arith.constant 0 : index
    %c1 = arith.constant 1 : index
    %72 = vector.load %arg4[%c0_21, %c0_22, %c1] : memref<1x1x10xf32, #tpu.memory_space<vmem>>, vector<1x1x1xf32>
    %73 = vector.shape_cast %72 : vector<1x1x1xf32> to vector<1x1xf32>
    %74 = vector.shape_cast %22 : vector<1x1xf32> to vector<1x1x1xf32>
    tpu.vector_store %arg4[%c0_21, %c0_22, %c1], %74 {strides = array<i32>} : memref<1x1x10xf32, #tpu.memory_space<vmem>>, vector<1x1x1xf32>,
    %75 = tpu.iota {dimensions = array<i32: 0>} : vector<32x128xi32>
    %76 = tpu.iota {dimensions = array<i32: 1>} : vector<32x128xi32>
    %c0_i32 = arith.constant 0 : i32
    %77 = vector.broadcast %c0_i32 : i32 to vector<32x128xi32>
    %78 = arith.andi %75, %77 : vector<32x128xi32>
    %c0_i32_23 = arith.constant 0 : i32
    %79 = vector.broadcast %c0_i32_23 : i32 to vector<32x128xi32>
    %80 = arith.cmpi eq, %78, %79 : vector<32x128xi32>
    %c0_i32_24 = arith.constant 0 : i32
    %81 = vector.broadcast %c0_i32_24 : i32 to vector<32x128xi32>
    %82 = arith.andi %76, %81 : vector<32x128xi32>
    %c0_i32_25 = arith.constant 0 : i32
    %83 = vector.broadcast %c0_i32_25 : i32 to vector<32x128xi32>
    %84 = arith.cmpi eq, %82, %83 : vector<32x128xi32>
    %c127_i32 = arith.constant 127 : i32
    %85 = tpu.dynamic_rotate %61 by %c127_i32 dim 1 : vector<32x128xf32>, i32 -> vector<32x128xf32>
    %c127_i32_26 = arith.constant 127 : i32
    %86 = tpu.dynamic_rotate %5 by %c127_i32_26 dim 1 : vector<32x128xf32>, i32 -> vector<32x128xf32>
    %c127_i32_27 = arith.constant 127 : i32
    %87 = tpu.dynamic_rotate %76 by %c127_i32_27 dim 1 : vector<32x128xi32>, i32 -> vector<32x128xi32>
    %88 = arith.minsi %76, %87 : vector<32x128xi32>
    %89 = arith.maxsi %76, %87 : vector<32x128xi32>
    %90 = arith.subi %89, %88 : vector<32x128xi32>
    %c1_i32 = arith.constant 1 : i32
    %91 = vector.broadcast %c1_i32 : i32 to vector<32x128xi32>
    %92 = arith.cmpi eq, %90, %91 : vector<32x128xi32>
    %c0_i32_28 = arith.constant 0 : i32
    %93 = vector.broadcast %c0_i32_28 : i32 to vector<32x128xi32>
    %94 = arith.andi %88, %93 : vector<32x128xi32>
    %c0_i32_29 = arith.constant 0 : i32
    %95 = vector.broadcast %c0_i32_29 : i32 to vector<32x128xi32>
    %96 = arith.cmpi eq, %94, %95 : vector<32x128xi32>
    %97 = arith.andi %92, %96 : vector<32x128xi1>
    %c32_i32 = arith.constant 32 : i32
    %98 = vector.broadcast %c32_i32 : i32 to vector<32x128xi32>
    %99 = arith.cmpi slt, %89, %98 : vector<32x128xi32>
    %100 = arith.andi %97, %99 : vector<32x128xi1>
    %101 = arith.andi %100, %80 : vector<32x128xi1>
    %102 = arith.mulf %5, %86 : vector<32x128xf32>
    %103 = arith.extui %101 : vector<32x128xi1> to vector<32x128xi32>
    %104 = arith.sitofp %103 : vector<32x128xi32> to vector<32x128xf32>
    %105 = arith.mulf %102, %104 : vector<32x128xf32>
    %106 = arith.subf %85, %61 : vector<32x128xf32>
    %107 = math.absf %106 : vector<32x128xf32>
    %108 = arith.mulf %107, %105 : vector<32x128xf32>
    %109 = vector.shape_cast %108 : vector<32x128xf32> to vector<1x32x128xf32>
    %cst_30 = arith.constant dense<0.000000e+00> : vector<1xf32>
    %110 = vector.multi_reduction <add>, %109, %cst_30 [1, 2] : vector<1x32x128xf32> to vector<1xf32>
    %111 = vector.shape_cast %110 : vector<1xf32> to vector<1x1x1xf32>
    %112 = vector.extract %111[0, 0, 0] : f32 from vector<1x1x1xf32>
    %113 = vector.broadcast %112 : f32 to vector<1x1xf32>
    %c31_i32 = arith.constant 31 : i32
    %114 = tpu.dynamic_rotate %61 by %c31_i32 dim 0 : vector<32x128xf32>, i32 -> vector<32x128xf32>
    %c31_i32_31 = arith.constant 31 : i32
    %115 = tpu.dynamic_rotate %5 by %c31_i32_31 dim 0 : vector<32x128xf32>, i32 -> vector<32x128xf32>
    %c31_i32_32 = arith.constant 31 : i32
    %116 = tpu.dynamic_rotate %75 by %c31_i32_32 dim 0 : vector<32x128xi32>, i32 -> vector<32x128xi32>
    %117 = arith.minsi %75, %116 : vector<32x128xi32>
    %118 = arith.maxsi %75, %116 : vector<32x128xi32>
    %119 = arith.subi %118, %117 : vector<32x128xi32>
    %c1_i32_33 = arith.constant 1 : i32
    %120 = vector.broadcast %c1_i32_33 : i32 to vector<32x128xi32>
    %121 = arith.cmpi eq, %119, %120 : vector<32x128xi32>
    %c0_i32_34 = arith.constant 0 : i32
    %122 = vector.broadcast %c0_i32_34 : i32 to vector<32x128xi32>
    %123 = arith.andi %117, %122 : vector<32x128xi32>
    %c0_i32_35 = arith.constant 0 : i32
    %124 = vector.broadcast %c0_i32_35 : i32 to vector<32x128xi32>
    %125 = arith.cmpi eq, %123, %124 : vector<32x128xi32>
    %126 = arith.andi %121, %125 : vector<32x128xi1>
    %c32_i32_36 = arith.constant 32 : i32
    %127 = vector.broadcast %c32_i32_36 : i32 to vector<32x128xi32>
    %128 = arith.cmpi slt, %118, %127 : vector<32x128xi32>
    %129 = arith.andi %126, %128 : vector<32x128xi1>
    %130 = arith.andi %129, %84 : vector<32x128xi1>
    %131 = arith.mulf %5, %115 : vector<32x128xf32>
    %132 = arith.extui %130 : vector<32x128xi1> to vector<32x128xi32>
    %133 = arith.sitofp %132 : vector<32x128xi32> to vector<32x128xf32>
    %134 = arith.mulf %131, %133 : vector<32x128xf32>
    %135 = arith.subf %114, %61 : vector<32x128xf32>
    %136 = math.absf %135 : vector<32x128xf32>
    %137 = arith.mulf %136, %134 : vector<32x128xf32>
    %138 = vector.shape_cast %137 : vector<32x128xf32> to vector<1x32x128xf32>
    %cst_37 = arith.constant dense<0.000000e+00> : vector<1xf32>
    %139 = vector.multi_reduction <add>, %138, %cst_37 [1, 2] : vector<1x32x128xf32> to vector<1xf32>
    %140 = vector.shape_cast %139 : vector<1xf32> to vector<1x1x1xf32>
    %141 = vector.extract %140[0, 0, 0] : f32 from vector<1x1x1xf32>
    %142 = vector.broadcast %141 : f32 to vector<1x1xf32>
    %143 = arith.andi %80, %84 : vector<32x128xi1>
    %144 = arith.extui %143 : vector<32x128xi1> to vector<32x128xi32>
    %145 = arith.sitofp %144 : vector<32x128xi32> to vector<32x128xf32>
    %146 = arith.mulf %5, %145 : vector<32x128xf32>
    %147 = vector.shape_cast %146 : vector<32x128xf32> to vector<1x32x128xf32>
    %cst_38 = arith.constant dense<0.000000e+00> : vector<1xf32>
    %148 = vector.multi_reduction <add>, %147, %cst_38 [1, 2] : vector<1x32x128xf32> to vector<1xf32>
    %149 = vector.shape_cast %148 : vector<1xf32> to vector<1x1x1xf32>
    %150 = vector.extract %149[0, 0, 0] : f32 from vector<1x1x1xf32>
    %151 = vector.broadcast %150 : f32 to vector<1x1xf32>
    %152 = arith.addf %113, %142 : vector<1x1xf32>
    %c0_39 = arith.constant 0 : index
    %c0_40 = arith.constant 0 : index
    %c2 = arith.constant 2 : index
    %153 = vector.load %arg4[%c0_39, %c0_40, %c2] : memref<1x1x10xf32, #tpu.memory_space<vmem>>, vector<1x1x1xf32>
    %154 = vector.shape_cast %153 : vector<1x1x1xf32> to vector<1x1xf32>
    %155 = vector.shape_cast %152 : vector<1x1xf32> to vector<1x1x1xf32>
    tpu.vector_store %arg4[%c0_39, %c0_40, %c2], %155 {strides = array<i32>} : memref<1x1x10xf32, #tpu.memory_space<vmem>>, vector<1x1x1xf32>,
    %c0_41 = arith.constant 0 : index
    %c0_42 = arith.constant 0 : index
    %c6 = arith.constant 6 : index
    %156 = vector.load %arg4[%c0_41, %c0_42, %c6] : memref<1x1x10xf32, #tpu.memory_space<vmem>>, vector<1x1x1xf32>
    %157 = vector.shape_cast %156 : vector<1x1x1xf32> to vector<1x1xf32>
    %158 = vector.shape_cast %151 : vector<1x1xf32> to vector<1x1x1xf32>
    tpu.vector_store %arg4[%c0_41, %c0_42, %c6], %158 {strides = array<i32>} : memref<1x1x10xf32, #tpu.memory_space<vmem>>, vector<1x1x1xf32>,
    %c1_i32_43 = arith.constant 1 : i32
    %159 = vector.broadcast %c1_i32_43 : i32 to vector<32x128xi32>
    %160 = arith.andi %75, %159 : vector<32x128xi32>
    %c0_i32_44 = arith.constant 0 : i32
    %161 = vector.broadcast %c0_i32_44 : i32 to vector<32x128xi32>
    %162 = arith.cmpi eq, %160, %161 : vector<32x128xi32>
    %c1_i32_45 = arith.constant 1 : i32
    %163 = vector.broadcast %c1_i32_45 : i32 to vector<32x128xi32>
    %164 = arith.andi %76, %163 : vector<32x128xi32>
    %c0_i32_46 = arith.constant 0 : i32
    %165 = vector.broadcast %c0_i32_46 : i32 to vector<32x128xi32>
    %166 = arith.cmpi eq, %164, %165 : vector<32x128xi32>
    %c126_i32 = arith.constant 126 : i32
    %167 = tpu.dynamic_rotate %61 by %c126_i32 dim 1 : vector<32x128xf32>, i32 -> vector<32x128xf32>
    %c126_i32_47 = arith.constant 126 : i32
    %168 = tpu.dynamic_rotate %5 by %c126_i32_47 dim 1 : vector<32x128xf32>, i32 -> vector<32x128xf32>
    %c126_i32_48 = arith.constant 126 : i32
    %169 = tpu.dynamic_rotate %76 by %c126_i32_48 dim 1 : vector<32x128xi32>, i32 -> vector<32x128xi32>
    %170 = arith.minsi %76, %169 : vector<32x128xi32>
    %171 = arith.maxsi %76, %169 : vector<32x128xi32>
    %172 = arith.subi %171, %170 : vector<32x128xi32>
    %c2_i32 = arith.constant 2 : i32
    %173 = vector.broadcast %c2_i32 : i32 to vector<32x128xi32>
    %174 = arith.cmpi eq, %172, %173 : vector<32x128xi32>
    %c1_i32_49 = arith.constant 1 : i32
    %175 = vector.broadcast %c1_i32_49 : i32 to vector<32x128xi32>
    %176 = arith.andi %170, %175 : vector<32x128xi32>
    %c0_i32_50 = arith.constant 0 : i32
    %177 = vector.broadcast %c0_i32_50 : i32 to vector<32x128xi32>
    %178 = arith.cmpi eq, %176, %177 : vector<32x128xi32>
    %179 = arith.andi %174, %178 : vector<32x128xi1>
    %c32_i32_51 = arith.constant 32 : i32
    %180 = vector.broadcast %c32_i32_51 : i32 to vector<32x128xi32>
    %181 = arith.cmpi slt, %171, %180 : vector<32x128xi32>
    %182 = arith.andi %179, %181 : vector<32x128xi1>
    %183 = arith.andi %182, %162 : vector<32x128xi1>
    %184 = arith.mulf %5, %168 : vector<32x128xf32>
    %185 = arith.extui %183 : vector<32x128xi1> to vector<32x128xi32>
    %186 = arith.sitofp %185 : vector<32x128xi32> to vector<32x128xf32>
    %187 = arith.mulf %184, %186 : vector<32x128xf32>
    %188 = arith.subf %167, %61 : vector<32x128xf32>
    %189 = math.absf %188 : vector<32x128xf32>
    %190 = arith.mulf %189, %187 : vector<32x128xf32>
    %191 = vector.shape_cast %190 : vector<32x128xf32> to vector<1x32x128xf32>
    %cst_52 = arith.constant dense<0.000000e+00> : vector<1xf32>
    %192 = vector.multi_reduction <add>, %191, %cst_52 [1, 2] : vector<1x32x128xf32> to vector<1xf32>
    %193 = vector.shape_cast %192 : vector<1xf32> to vector<1x1x1xf32>
    %194 = vector.extract %193[0, 0, 0] : f32 from vector<1x1x1xf32>
    %195 = vector.broadcast %194 : f32 to vector<1x1xf32>
    %c30_i32 = arith.constant 30 : i32
    %196 = tpu.dynamic_rotate %61 by %c30_i32 dim 0 : vector<32x128xf32>, i32 -> vector<32x128xf32>
    %c30_i32_53 = arith.constant 30 : i32
    %197 = tpu.dynamic_rotate %5 by %c30_i32_53 dim 0 : vector<32x128xf32>, i32 -> vector<32x128xf32>
    %c30_i32_54 = arith.constant 30 : i32
    %198 = tpu.dynamic_rotate %75 by %c30_i32_54 dim 0 : vector<32x128xi32>, i32 -> vector<32x128xi32>
    %199 = arith.minsi %75, %198 : vector<32x128xi32>
    %200 = arith.maxsi %75, %198 : vector<32x128xi32>
    %201 = arith.subi %200, %199 : vector<32x128xi32>
    %c2_i32_55 = arith.constant 2 : i32
    %202 = vector.broadcast %c2_i32_55 : i32 to vector<32x128xi32>
    %203 = arith.cmpi eq, %201, %202 : vector<32x128xi32>
    %c1_i32_56 = arith.constant 1 : i32
    %204 = vector.broadcast %c1_i32_56 : i32 to vector<32x128xi32>
    %205 = arith.andi %199, %204 : vector<32x128xi32>
    %c0_i32_57 = arith.constant 0 : i32
    %206 = vector.broadcast %c0_i32_57 : i32 to vector<32x128xi32>
    %207 = arith.cmpi eq, %205, %206 : vector<32x128xi32>
    %208 = arith.andi %203, %207 : vector<32x128xi1>
    %c32_i32_58 = arith.constant 32 : i32
    %209 = vector.broadcast %c32_i32_58 : i32 to vector<32x128xi32>
    %210 = arith.cmpi slt, %200, %209 : vector<32x128xi32>
    %211 = arith.andi %208, %210 : vector<32x128xi1>
    %212 = arith.andi %211, %166 : vector<32x128xi1>
    %213 = arith.mulf %5, %197 : vector<32x128xf32>
    %214 = arith.extui %212 : vector<32x128xi1> to vector<32x128xi32>
    %215 = arith.sitofp %214 : vector<32x128xi32> to vector<32x128xf32>
    %216 = arith.mulf %213, %215 : vector<32x128xf32>
    %217 = arith.subf %196, %61 : vector<32x128xf32>
    %218 = math.absf %217 : vector<32x128xf32>
    %219 = arith.mulf %218, %216 : vector<32x128xf32>
    %220 = vector.shape_cast %219 : vector<32x128xf32> to vector<1x32x128xf32>
    %cst_59 = arith.constant dense<0.000000e+00> : vector<1xf32>
    %221 = vector.multi_reduction <add>, %220, %cst_59 [1, 2] : vector<1x32x128xf32> to vector<1xf32>
    %222 = vector.shape_cast %221 : vector<1xf32> to vector<1x1x1xf32>
    %223 = vector.extract %222[0, 0, 0] : f32 from vector<1x1x1xf32>
    %224 = vector.broadcast %223 : f32 to vector<1x1xf32>
    %225 = arith.andi %162, %166 : vector<32x128xi1>
    %226 = arith.extui %225 : vector<32x128xi1> to vector<32x128xi32>
    %227 = arith.sitofp %226 : vector<32x128xi32> to vector<32x128xf32>
    %228 = arith.mulf %5, %227 : vector<32x128xf32>
    %229 = vector.shape_cast %228 : vector<32x128xf32> to vector<1x32x128xf32>
    %cst_60 = arith.constant dense<0.000000e+00> : vector<1xf32>
    %230 = vector.multi_reduction <add>, %229, %cst_60 [1, 2] : vector<1x32x128xf32> to vector<1xf32>
    %231 = vector.shape_cast %230 : vector<1xf32> to vector<1x1x1xf32>
    %232 = vector.extract %231[0, 0, 0] : f32 from vector<1x1x1xf32>
    %233 = vector.broadcast %232 : f32 to vector<1x1xf32>
    %234 = arith.addf %195, %224 : vector<1x1xf32>
    %c0_61 = arith.constant 0 : index
    %c0_62 = arith.constant 0 : index
    %c3 = arith.constant 3 : index
    %235 = vector.load %arg4[%c0_61, %c0_62, %c3] : memref<1x1x10xf32, #tpu.memory_space<vmem>>, vector<1x1x1xf32>
    %236 = vector.shape_cast %235 : vector<1x1x1xf32> to vector<1x1xf32>
    %237 = vector.shape_cast %234 : vector<1x1xf32> to vector<1x1x1xf32>
    tpu.vector_store %arg4[%c0_61, %c0_62, %c3], %237 {strides = array<i32>} : memref<1x1x10xf32, #tpu.memory_space<vmem>>, vector<1x1x1xf32>,
    %c0_63 = arith.constant 0 : index
    %c0_64 = arith.constant 0 : index
    %c7 = arith.constant 7 : index
    %238 = vector.load %arg4[%c0_63, %c0_64, %c7] : memref<1x1x10xf32, #tpu.memory_space<vmem>>, vector<1x1x1xf32>
    %239 = vector.shape_cast %238 : vector<1x1x1xf32> to vector<1x1xf32>
    %240 = vector.shape_cast %233 : vector<1x1xf32> to vector<1x1x1xf32>
    tpu.vector_store %arg4[%c0_63, %c0_64, %c7], %240 {strides = array<i32>} : memref<1x1x10xf32, #tpu.memory_space<vmem>>, vector<1x1x1xf32>,
    %c3_i32 = arith.constant 3 : i32
    %241 = vector.broadcast %c3_i32 : i32 to vector<32x128xi32>
    %242 = arith.andi %75, %241 : vector<32x128xi32>
    %c0_i32_65 = arith.constant 0 : i32
    %243 = vector.broadcast %c0_i32_65 : i32 to vector<32x128xi32>
    %244 = arith.cmpi eq, %242, %243 : vector<32x128xi32>
    %c3_i32_66 = arith.constant 3 : i32
    %245 = vector.broadcast %c3_i32_66 : i32 to vector<32x128xi32>
    %246 = arith.andi %76, %245 : vector<32x128xi32>
    %c0_i32_67 = arith.constant 0 : i32
    %247 = vector.broadcast %c0_i32_67 : i32 to vector<32x128xi32>
    %248 = arith.cmpi eq, %246, %247 : vector<32x128xi32>
    %c124_i32 = arith.constant 124 : i32
    %249 = tpu.dynamic_rotate %61 by %c124_i32 dim 1 : vector<32x128xf32>, i32 -> vector<32x128xf32>
    %c124_i32_68 = arith.constant 124 : i32
    %250 = tpu.dynamic_rotate %5 by %c124_i32_68 dim 1 : vector<32x128xf32>, i32 -> vector<32x128xf32>
    %c124_i32_69 = arith.constant 124 : i32
    %251 = tpu.dynamic_rotate %76 by %c124_i32_69 dim 1 : vector<32x128xi32>, i32 -> vector<32x128xi32>
    %252 = arith.minsi %76, %251 : vector<32x128xi32>
    %253 = arith.maxsi %76, %251 : vector<32x128xi32>
    %254 = arith.subi %253, %252 : vector<32x128xi32>
    %c4_i32 = arith.constant 4 : i32
    %255 = vector.broadcast %c4_i32 : i32 to vector<32x128xi32>
    %256 = arith.cmpi eq, %254, %255 : vector<32x128xi32>
    %c3_i32_70 = arith.constant 3 : i32
    %257 = vector.broadcast %c3_i32_70 : i32 to vector<32x128xi32>
    %258 = arith.andi %252, %257 : vector<32x128xi32>
    %c0_i32_71 = arith.constant 0 : i32
    %259 = vector.broadcast %c0_i32_71 : i32 to vector<32x128xi32>
    %260 = arith.cmpi eq, %258, %259 : vector<32x128xi32>
    %261 = arith.andi %256, %260 : vector<32x128xi1>
    %c32_i32_72 = arith.constant 32 : i32
    %262 = vector.broadcast %c32_i32_72 : i32 to vector<32x128xi32>
    %263 = arith.cmpi slt, %253, %262 : vector<32x128xi32>
    %264 = arith.andi %261, %263 : vector<32x128xi1>
    %265 = arith.andi %264, %244 : vector<32x128xi1>
    %266 = arith.mulf %5, %250 : vector<32x128xf32>
    %267 = arith.extui %265 : vector<32x128xi1> to vector<32x128xi32>
    %268 = arith.sitofp %267 : vector<32x128xi32> to vector<32x128xf32>
    %269 = arith.mulf %266, %268 : vector<32x128xf32>
    %270 = arith.subf %249, %61 : vector<32x128xf32>
    %271 = math.absf %270 : vector<32x128xf32>
    %272 = arith.mulf %271, %269 : vector<32x128xf32>
    %273 = vector.shape_cast %272 : vector<32x128xf32> to vector<1x32x128xf32>
    %cst_73 = arith.constant dense<0.000000e+00> : vector<1xf32>
    %274 = vector.multi_reduction <add>, %273, %cst_73 [1, 2] : vector<1x32x128xf32> to vector<1xf32>
    %275 = vector.shape_cast %274 : vector<1xf32> to vector<1x1x1xf32>
    %276 = vector.extract %275[0, 0, 0] : f32 from vector<1x1x1xf32>
    %277 = vector.broadcast %276 : f32 to vector<1x1xf32>
    %c28_i32 = arith.constant 28 : i32
    %278 = tpu.dynamic_rotate %61 by %c28_i32 dim 0 : vector<32x128xf32>, i32 -> vector<32x128xf32>
    %c28_i32_74 = arith.constant 28 : i32
    %279 = tpu.dynamic_rotate %5 by %c28_i32_74 dim 0 : vector<32x128xf32>, i32 -> vector<32x128xf32>
    %c28_i32_75 = arith.constant 28 : i32
    %280 = tpu.dynamic_rotate %75 by %c28_i32_75 dim 0 : vector<32x128xi32>, i32 -> vector<32x128xi32>
    %281 = arith.minsi %75, %280 : vector<32x128xi32>
    %282 = arith.maxsi %75, %280 : vector<32x128xi32>
    %283 = arith.subi %282, %281 : vector<32x128xi32>
    %c4_i32_76 = arith.constant 4 : i32
    %284 = vector.broadcast %c4_i32_76 : i32 to vector<32x128xi32>
    %285 = arith.cmpi eq, %283, %284 : vector<32x128xi32>
    %c3_i32_77 = arith.constant 3 : i32
    %286 = vector.broadcast %c3_i32_77 : i32 to vector<32x128xi32>
    %287 = arith.andi %281, %286 : vector<32x128xi32>
    %c0_i32_78 = arith.constant 0 : i32
    %288 = vector.broadcast %c0_i32_78 : i32 to vector<32x128xi32>
    %289 = arith.cmpi eq, %287, %288 : vector<32x128xi32>
    %290 = arith.andi %285, %289 : vector<32x128xi1>
    %c32_i32_79 = arith.constant 32 : i32
    %291 = vector.broadcast %c32_i32_79 : i32 to vector<32x128xi32>
    %292 = arith.cmpi slt, %282, %291 : vector<32x128xi32>
    %293 = arith.andi %290, %292 : vector<32x128xi1>
    %294 = arith.andi %293, %248 : vector<32x128xi1>
    %295 = arith.mulf %5, %279 : vector<32x128xf32>
    %296 = arith.extui %294 : vector<32x128xi1> to vector<32x128xi32>
    %297 = arith.sitofp %296 : vector<32x128xi32> to vector<32x128xf32>
    %298 = arith.mulf %295, %297 : vector<32x128xf32>
    %299 = arith.subf %278, %61 : vector<32x128xf32>
    %300 = math.absf %299 : vector<32x128xf32>
    %301 = arith.mulf %300, %298 : vector<32x128xf32>
    %302 = vector.shape_cast %301 : vector<32x128xf32> to vector<1x32x128xf32>
    %cst_80 = arith.constant dense<0.000000e+00> : vector<1xf32>
    %303 = vector.multi_reduction <add>, %302, %cst_80 [1, 2] : vector<1x32x128xf32> to vector<1xf32>
    %304 = vector.shape_cast %303 : vector<1xf32> to vector<1x1x1xf32>
    %305 = vector.extract %304[0, 0, 0] : f32 from vector<1x1x1xf32>
    %306 = vector.broadcast %305 : f32 to vector<1x1xf32>
    %307 = arith.andi %244, %248 : vector<32x128xi1>
    %308 = arith.extui %307 : vector<32x128xi1> to vector<32x128xi32>
    %309 = arith.sitofp %308 : vector<32x128xi32> to vector<32x128xf32>
    %310 = arith.mulf %5, %309 : vector<32x128xf32>
    %311 = vector.shape_cast %310 : vector<32x128xf32> to vector<1x32x128xf32>
    %cst_81 = arith.constant dense<0.000000e+00> : vector<1xf32>
    %312 = vector.multi_reduction <add>, %311, %cst_81 [1, 2] : vector<1x32x128xf32> to vector<1xf32>
    %313 = vector.shape_cast %312 : vector<1xf32> to vector<1x1x1xf32>
    %314 = vector.extract %313[0, 0, 0] : f32 from vector<1x1x1xf32>
    %315 = vector.broadcast %314 : f32 to vector<1x1xf32>
    %316 = arith.addf %277, %306 : vector<1x1xf32>
    %c0_82 = arith.constant 0 : index
    %c0_83 = arith.constant 0 : index
    %c4 = arith.constant 4 : index
    %317 = vector.load %arg4[%c0_82, %c0_83, %c4] : memref<1x1x10xf32, #tpu.memory_space<vmem>>, vector<1x1x1xf32>
    %318 = vector.shape_cast %317 : vector<1x1x1xf32> to vector<1x1xf32>
    %319 = vector.shape_cast %316 : vector<1x1xf32> to vector<1x1x1xf32>
    tpu.vector_store %arg4[%c0_82, %c0_83, %c4], %319 {strides = array<i32>} : memref<1x1x10xf32, #tpu.memory_space<vmem>>, vector<1x1x1xf32>,
    %c0_84 = arith.constant 0 : index
    %c0_85 = arith.constant 0 : index
    %c8 = arith.constant 8 : index
    %320 = vector.load %arg4[%c0_84, %c0_85, %c8] : memref<1x1x10xf32, #tpu.memory_space<vmem>>, vector<1x1x1xf32>
    %321 = vector.shape_cast %320 : vector<1x1x1xf32> to vector<1x1xf32>
    %322 = vector.shape_cast %315 : vector<1x1xf32> to vector<1x1x1xf32>
    tpu.vector_store %arg4[%c0_84, %c0_85, %c8], %322 {strides = array<i32>} : memref<1x1x10xf32, #tpu.memory_space<vmem>>, vector<1x1x1xf32>,
    %c7_i32 = arith.constant 7 : i32
    %323 = vector.broadcast %c7_i32 : i32 to vector<32x128xi32>
    %324 = arith.andi %75, %323 : vector<32x128xi32>
    %c0_i32_86 = arith.constant 0 : i32
    %325 = vector.broadcast %c0_i32_86 : i32 to vector<32x128xi32>
    %326 = arith.cmpi eq, %324, %325 : vector<32x128xi32>
    %c7_i32_87 = arith.constant 7 : i32
    %327 = vector.broadcast %c7_i32_87 : i32 to vector<32x128xi32>
    %328 = arith.andi %76, %327 : vector<32x128xi32>
    %c0_i32_88 = arith.constant 0 : i32
    %329 = vector.broadcast %c0_i32_88 : i32 to vector<32x128xi32>
    %330 = arith.cmpi eq, %328, %329 : vector<32x128xi32>
    %c120_i32 = arith.constant 120 : i32
    %331 = tpu.dynamic_rotate %61 by %c120_i32 dim 1 : vector<32x128xf32>, i32 -> vector<32x128xf32>
    %c120_i32_89 = arith.constant 120 : i32
    %332 = tpu.dynamic_rotate %5 by %c120_i32_89 dim 1 : vector<32x128xf32>, i32 -> vector<32x128xf32>
    %c120_i32_90 = arith.constant 120 : i32
    %333 = tpu.dynamic_rotate %76 by %c120_i32_90 dim 1 : vector<32x128xi32>, i32 -> vector<32x128xi32>
    %334 = arith.minsi %76, %333 : vector<32x128xi32>
    %335 = arith.maxsi %76, %333 : vector<32x128xi32>
    %336 = arith.subi %335, %334 : vector<32x128xi32>
    %c8_i32 = arith.constant 8 : i32
    %337 = vector.broadcast %c8_i32 : i32 to vector<32x128xi32>
    %338 = arith.cmpi eq, %336, %337 : vector<32x128xi32>
    %c7_i32_91 = arith.constant 7 : i32
    %339 = vector.broadcast %c7_i32_91 : i32 to vector<32x128xi32>
    %340 = arith.andi %334, %339 : vector<32x128xi32>
    %c0_i32_92 = arith.constant 0 : i32
    %341 = vector.broadcast %c0_i32_92 : i32 to vector<32x128xi32>
    %342 = arith.cmpi eq, %340, %341 : vector<32x128xi32>
    %343 = arith.andi %338, %342 : vector<32x128xi1>
    %c32_i32_93 = arith.constant 32 : i32
    %344 = vector.broadcast %c32_i32_93 : i32 to vector<32x128xi32>
    %345 = arith.cmpi slt, %335, %344 : vector<32x128xi32>
    %346 = arith.andi %343, %345 : vector<32x128xi1>
    %347 = arith.andi %346, %326 : vector<32x128xi1>
    %348 = arith.mulf %5, %332 : vector<32x128xf32>
    %349 = arith.extui %347 : vector<32x128xi1> to vector<32x128xi32>
    %350 = arith.sitofp %349 : vector<32x128xi32> to vector<32x128xf32>
    %351 = arith.mulf %348, %350 : vector<32x128xf32>
    %352 = arith.subf %331, %61 : vector<32x128xf32>
    %353 = math.absf %352 : vector<32x128xf32>
    %354 = arith.mulf %353, %351 : vector<32x128xf32>
    %355 = vector.shape_cast %354 : vector<32x128xf32> to vector<1x32x128xf32>
    %cst_94 = arith.constant dense<0.000000e+00> : vector<1xf32>
    %356 = vector.multi_reduction <add>, %355, %cst_94 [1, 2] : vector<1x32x128xf32> to vector<1xf32>
    %357 = vector.shape_cast %356 : vector<1xf32> to vector<1x1x1xf32>
    %358 = vector.extract %357[0, 0, 0] : f32 from vector<1x1x1xf32>
    %359 = vector.broadcast %358 : f32 to vector<1x1xf32>
    %c24_i32 = arith.constant 24 : i32
    %360 = tpu.dynamic_rotate %61 by %c24_i32 dim 0 : vector<32x128xf32>, i32 -> vector<32x128xf32>
    %c24_i32_95 = arith.constant 24 : i32
    %361 = tpu.dynamic_rotate %5 by %c24_i32_95 dim 0 : vector<32x128xf32>, i32 -> vector<32x128xf32>
    %c24_i32_96 = arith.constant 24 : i32
    %362 = tpu.dynamic_rotate %75 by %c24_i32_96 dim 0 : vector<32x128xi32>, i32 -> vector<32x128xi32>
    %363 = arith.minsi %75, %362 : vector<32x128xi32>
    %364 = arith.maxsi %75, %362 : vector<32x128xi32>
    %365 = arith.subi %364, %363 : vector<32x128xi32>
    %c8_i32_97 = arith.constant 8 : i32
    %366 = vector.broadcast %c8_i32_97 : i32 to vector<32x128xi32>
    %367 = arith.cmpi eq, %365, %366 : vector<32x128xi32>
    %c7_i32_98 = arith.constant 7 : i32
    %368 = vector.broadcast %c7_i32_98 : i32 to vector<32x128xi32>
    %369 = arith.andi %363, %368 : vector<32x128xi32>
    %c0_i32_99 = arith.constant 0 : i32
    %370 = vector.broadcast %c0_i32_99 : i32 to vector<32x128xi32>
    %371 = arith.cmpi eq, %369, %370 : vector<32x128xi32>
    %372 = arith.andi %367, %371 : vector<32x128xi1>
    %c32_i32_100 = arith.constant 32 : i32
    %373 = vector.broadcast %c32_i32_100 : i32 to vector<32x128xi32>
    %374 = arith.cmpi slt, %364, %373 : vector<32x128xi32>
    %375 = arith.andi %372, %374 : vector<32x128xi1>
    %376 = arith.andi %375, %330 : vector<32x128xi1>
    %377 = arith.mulf %5, %361 : vector<32x128xf32>
    %378 = arith.extui %376 : vector<32x128xi1> to vector<32x128xi32>
    %379 = arith.sitofp %378 : vector<32x128xi32> to vector<32x128xf32>
    %380 = arith.mulf %377, %379 : vector<32x128xf32>
    %381 = arith.subf %360, %61 : vector<32x128xf32>
    %382 = math.absf %381 : vector<32x128xf32>
    %383 = arith.mulf %382, %380 : vector<32x128xf32>
    %384 = vector.shape_cast %383 : vector<32x128xf32> to vector<1x32x128xf32>
    %cst_101 = arith.constant dense<0.000000e+00> : vector<1xf32>
    %385 = vector.multi_reduction <add>, %384, %cst_101 [1, 2] : vector<1x32x128xf32> to vector<1xf32>
    %386 = vector.shape_cast %385 : vector<1xf32> to vector<1x1x1xf32>
    %387 = vector.extract %386[0, 0, 0] : f32 from vector<1x1x1xf32>
    %388 = vector.broadcast %387 : f32 to vector<1x1xf32>
    %389 = arith.andi %326, %330 : vector<32x128xi1>
    %390 = arith.extui %389 : vector<32x128xi1> to vector<32x128xi32>
    %391 = arith.sitofp %390 : vector<32x128xi32> to vector<32x128xf32>
    %392 = arith.mulf %5, %391 : vector<32x128xf32>
    %393 = vector.shape_cast %392 : vector<32x128xf32> to vector<1x32x128xf32>
    %cst_102 = arith.constant dense<0.000000e+00> : vector<1xf32>
    %394 = vector.multi_reduction <add>, %393, %cst_102 [1, 2] : vector<1x32x128xf32> to vector<1xf32>
    %395 = vector.shape_cast %394 : vector<1xf32> to vector<1x1x1xf32>
    %396 = vector.extract %395[0, 0, 0] : f32 from vector<1x1x1xf32>
    %397 = vector.broadcast %396 : f32 to vector<1x1xf32>
    %398 = arith.addf %359, %388 : vector<1x1xf32>
    %c0_103 = arith.constant 0 : index
    %c0_104 = arith.constant 0 : index
    %c5 = arith.constant 5 : index
    %399 = vector.load %arg4[%c0_103, %c0_104, %c5] : memref<1x1x10xf32, #tpu.memory_space<vmem>>, vector<1x1x1xf32>
    %400 = vector.shape_cast %399 : vector<1x1x1xf32> to vector<1x1xf32>
    %401 = vector.shape_cast %398 : vector<1x1xf32> to vector<1x1x1xf32>
    tpu.vector_store %arg4[%c0_103, %c0_104, %c5], %401 {strides = array<i32>} : memref<1x1x10xf32, #tpu.memory_space<vmem>>, vector<1x1x1xf32>,
    %c0_105 = arith.constant 0 : index
    %c0_106 = arith.constant 0 : index
    %c9 = arith.constant 9 : index
    %402 = vector.load %arg4[%c0_105, %c0_106, %c9] : memref<1x1x10xf32, #tpu.memory_space<vmem>>, vector<1x1x1xf32>
    %403 = vector.shape_cast %402 : vector<1x1x1xf32> to vector<1x1xf32>
    %404 = vector.shape_cast %397 : vector<1x1xf32> to vector<1x1x1xf32>
    tpu.vector_store %arg4[%c0_105, %c0_106, %c9], %404 {strides = array<i32>} : memref<1x1x10xf32, #tpu.memory_space<vmem>>, vector<1x1x1xf32>,
    return
  }
  func.func @transform_0(%arg0: i32) -> (i32, i32, i32) {
    %c0_i32 = arith.constant 0 : i32
    %c0_i32_0 = arith.constant 0 : i32
    %c0_i32_1 = arith.constant 0 : i32
    return %arg0, %c0_i32, %c0_i32_0 : i32, i32, i32
  }
  func.func @transform_1(%arg0: i32) -> (i32, i32, i32) {
    %c0_i32 = arith.constant 0 : i32
    %c0_i32_0 = arith.constant 0 : i32
    %c0_i32_1 = arith.constant 0 : i32
    return %arg0, %c0_i32, %c0_i32_0 : i32, i32, i32
  }
  func.func @transform_2(%arg0: i32) -> (i32, i32, i32) {
    %c0_i32 = arith.constant 0 : i32
    %c0_i32_0 = arith.constant 0 : i32
    %c0_i32_1 = arith.constant 0 : i32
    return %arg0, %c0_i32, %c0_i32_0 : i32, i32, i32
  }
  func.func @transform_3(%arg0: i32) -> (i32, i32, i32) {
    %c0_i32 = arith.constant 0 : i32
    %c0_i32_0 = arith.constant 0 : i32
    %c0_i32_1 = arith.constant 0 : i32
    return %arg0, %c0_i32, %c0_i32_0 : i32, i32, i32
  }
}

</mosaic_0001>

<bundles_post_ra>
// kernel: tpu_custom_call.1
= control target key start
LH: loop header
LB: loop body
LE: loop exit
PB: predicated region body
PF: predicated region fallthrough
CT: control target
= control target key end

     0   :  { %s3121_s0 = inlined_call_operand.hbm [shape: f32[2,32,128], index: 0, kind: input, shape index: {}]   ;;  %s3122_s1 = inlined_call_operand.hbm [shape: f32[2,32,128], index: 1, kind: input, shape index: {}]   ;;  %s3123_s2 = inlined_call_operand.hbm [shape: f32[2,32,128], index: 2, kind: input, shape index: {}]   ;;  %s3124_s3 = inlined_call_operand.hbm [shape: f32[2,1,10], index: 3, kind: output, shape index: {}]  }
   0x1   :  { %3142 = sst [smem:[#allocation12_spill]] %s3121_s0 }
   0x2   :  { %8 = vsyncpa [#allocation3], 0 }
   0x3   :  { %10 = vsyncpa [#allocation3 + $0x1], 0 }
   0x4   :  { %11 = vsyncpa [#allocation6], 0 }
   0x5   :  { %13 = vsyncpa [#allocation6 + $0x1], 0 }
   0x6   :  { %14 = vsyncpa [#allocation4], 0 }
   0x7   :  { %16 = vsyncpa [#allocation4 + $0x1], 0  ;;  %s1738_s12 = smov 0   ;;  %s1740_s13 = smov 0  }
   0x8   :  { %s1742_s14 = smov 0   ;;  %s1744_s15 = smov 0  }
   0x9 LB: > { %s1759_s16 = sadd.s32 4294967295, %s1705_s15   ;;  %s1380_s17 = sadd.s32 4294967294, %s1705_s15   ;;  %s1705_s15 = sphi %s1744_s15, %s3291_s15   ;;  %s1701_s14 = sphi %s1742_s14, %s3290_s14   ;;  %s1697_s13 = sphi %s1740_s13, %s3289_s13   ;;  %s1693_s12 = sphi %s1738_s12, %s3288_s12  }
   0xa   : > { %s1763_s18 = sadd.s32 1, %s1705_s15   ;;  %s29_s19 = sadd.s32 1, %s1701_s14 }
   0xb   : > { %s26_s20 = ssub.s32 %s1705_s15, %s1763_s18  ;;  %p36_p0 = scmp.ne.s32.totalorder %s1701_s14, %s1697_s13 }
   0xc   : > { %p27_p1 = scmp.eq.s32.totalorder %s26_s20, 0  ;;  %p37_p2 = scmp.eq.s32.totalorder %s1705_s15, 0 }
   0xd   : > { %p42_p3 = scmp.ne.s32.totalorder %s1697_s13, %s1693_s12  ;;  %p43_p4 = scmp.eq.s32.totalorder %s1759_s16, 0 }
   0xe   : > { %s1775_s21 = scalar_select %p27_p1, %s1701_s14, %s29_s19  }
   0xf   : > { %p38_p5 = por %p37_p2, %p36_p0  ;;  %p1777_p6 = por %p43_p4, %p42_p3 }
  0x10   : > { %p118_p7 = scmp.eq.s32.totalorder %s1759_s16, 1  ;;  %p124_p8 = scmp.eq.s32.totalorder %s1380_s17, 1 }
  0x11   : > { %s3143_s22 = scalar_select %p1777_p6, 1, 0 }
  0x12   : > { %p1498_p10 = scmp.lt.s32.totalorder %s1705_s15, 2  ;;  %p1784_p11 = por %p118_p7, %p36_p0 }
  0x13   : > { %p1788_p12 = por %p124_p8, %p42_p3  ;;  %s144_s25 = sand.u32 1, %s1701_s14  }
  0x14   : > { %s3144_s23 = scalar_select %p1784_p11, 1, 0 }
  0x15   : > { %s3145_s24 = scalar_select %p1788_p12, 1, 0 }
  0x16   : > { %s1794_s26 = sshll.u32 %s1705_s15, 9  ;;  %s1798_s27 = sshll.u32 %s144_s25, 5 }
  0x17   : > { %p1800_p13 = pnand %p1498_p10, %p38_p5  ;;  %s165_s29 = sand.u32 1, %s1705_s15  }
  0x18   : > { %s1809_s5 = scalar_lea.hbm %s3122_s1, %s1794_s26  ;;  %s169_s6 = scalar_lea.vmem [#allocation5], %s1798_s27 }
  0x19   : > { %s176_s7 = sshll.u32 %s169_s6, 4  ;;  %s1815_s8 = scalar_lea.sflag [#allocation6], %s165_s29  ;;  %s1812_s7 = int_to_ptr.vmem [resolvable:$true] %s176_s7 }
  0x1a   : > { %s1545_s9 = scalar_lea.hbm %s1809_s5, 512  ;;  %p1821_p2 = pneg %p1800_p13 }
  0x1b   : > { %p1546_p1 = scmp.ne.s32.totalorder %s1809_s5, %s1545_s9  ;;  %s1550_s19 = scalar_lea.hbm %s3122_s1, 1024 }
  0x1c   : > { %p1551_p5 = scmp.lt.u32.totalorder %s1809_s5, %s3122_s1  ;;  %p1552_p7 = scmp.lt.u32.totalorder %s1550_s19, %s1545_s9 }
  0x1d   : > { %p1548_p3 = pnand %p1821_p2, %p1546_p1  ;;  %p1554_p10 = scmp.lt.u32.totalorder %s1545_s9, %s1809_s5 }
  0x1e   : > { %p1553_p8 = por %p1552_p7, %p1551_p5 }
  0x1f   : > { %p1549_p4 = pneg %p1548_p3 }
  0x20   : > { %p1555_p9 = por %p1554_p10, %p1553_p8 }
  0x22   : > { %p1556_p0 = pnand %p1555_p9, %p1549_p4 }
  0x24   : > { %1559 = shalt.err (!%p1556_p0)
}
  0x25   : > { %s1560_s29 = scalar_lea.vmem %s1812_s7, 512  ;;  %s1707_s4 = smov [#allocation5]  }
  0x26   : > { %p1561_p1 = scmp.ne.s32.totalorder %s1812_s7, %s1560_s29  ;;  %s1565_s6 = sshll.u32 %s1707_s4, 4  ;;  %s1566_s6 = int_to_ptr.vmem [resolvable:$false] %s1565_s6 }
  0x27   : > { %s1567_s11 = scalar_lea.vmem %s1566_s6, 1024  ;;  %p1568_p11 = scmp.lt.s32.totalorder %s1812_s7, %s1566_s6 }
  0x28   : > { %p1563_p3 = pnand %p1561_p1, %p1821_p2  ;;  %p1569_p6 = scmp.lt.s32.totalorder %s1567_s11, %s1560_s29 }
  0x2a   : > { %p1564_p12 = pneg %p1563_p3  ;;  %p1570_p5 = por %p1569_p6, %p1568_p11 }
  0x2c   : > { %p1571_p7 = pnand %p1570_p5, %p1564_p12 }
  0x2e   : > { %1574 = shalt.err (!%p1571_p7)
}
  0x2f   : > { %s3127_s9 = smov 128   ;;  %s3129_s17 = smov 8  }
  0x30   : > { %1490 = dma.hbm_to_vmem [thread:$0]  (!%p1800_p13), %s1809_s5, 512, %s1812_s7, %s1815_s8, %s3127_s9, %s3127_s9, %s3129_s17  }
  0x31   : > { %p205_p6 = scmp.lt.s32.totalorder %s1705_s15, 3  ;;  %s3148_s0 = sld [smem:[#allocation12_spill]] }
  0x32   : > { %p3149_p9 = scmp.ge.s32.totalorder %s1705_s15, 1  ;;  %s148_s4 = scalar_lea.vmem [#allocation2], %s1798_s27 }
  0x33   : > { %s155_s6 = sshll.u32 %s148_s4, 4  ;;  %s1866_s5 = scalar_lea.sflag [#allocation3], %s144_s25  ;;  %s1862_s6 = int_to_ptr.vmem [resolvable:$true] %s155_s6 }
  0x34   : > { %p1857_p11 = pnand %p3149_p9, %p205_p6 }
  0x36   : > { %s3150_s29 = scalar_select %p1857_p11, 1, 0 }
  0x37   : > { %s1853_s30 = scalar_lea.hbm %s3148_s0, %s1794_s26  ;;  %s1580_s20 = scalar_lea.hbm %s3148_s0, 1024 }
  0x38   : > { %s1575_s7 = scalar_lea.hbm %s1853_s30, 512  ;;  %p1581_p8 = scmp.lt.u32.totalorder %s1853_s30, %s3148_s0 }
  0x39   : > { %p1576_p12 = scmp.ne.s32.totalorder %s1853_s30, %s1575_s7  ;;  %p1582_p10 = scmp.lt.u32.totalorder %s1580_s20, %s1575_s7 }
  0x3a   : > { %p1584_p3 = scmp.lt.u32.totalorder %s1575_s7, %s1853_s30 }
  0x3b   : > { %p1578_p0 = pnand %p1576_p12, %p1821_p2  ;;  %p1583_p1 = por %p1582_p10, %p1581_p8 }
  0x3d   : > { %p1579_p4 = pneg %p1578_p0  ;;  %p1585_p5 = por %p1584_p3, %p1583_p1 }
  0x3f   : > { %p1586_p7 = pnand %p1585_p5, %p1579_p4 }
  0x41   : > { %1589 = shalt.err (!%p1586_p7)
}
  0x42   : > { %s1590_s25 = scalar_lea.vmem %s1862_s6, 512  ;;  %s1710_s4 = smov [#allocation2]  }
  0x43   : > { %p1591_p6 = scmp.ne.s32.totalorder %s1862_s6, %s1590_s25  ;;  %s1595_s11 = sshll.u32 %s1710_s4, 4  ;;  %s1596_s11 = int_to_ptr.vmem [resolvable:$false] %s1595_s11 }
  0x44   : > { %s1597_s9 = scalar_lea.vmem %s1596_s11, 1024  ;;  %p1598_p0 = scmp.lt.s32.totalorder %s1862_s6, %s1596_s11 }
  0x45   : > { %p1593_p9 = pnand %p1591_p6, %p1821_p2  ;;  %p1599_p11 = scmp.lt.s32.totalorder %s1597_s9, %s1590_s25 }
  0x47   : > { %p1594_p12 = pneg %p1593_p9  ;;  %p1600_p8 = por %p1599_p11, %p1598_p0 }
  0x49   : > { %p1601_p10 = pnand %p1600_p8, %p1594_p12 }
  0x4b   : > { %1604 = shalt.err (!%p1601_p10)
}
  0x4c   : > { %s3151_s17 = smov 8   ;;  %s3152_s7 = smov 128  }
  0x4d   : > { %1487 = dma.hbm_to_vmem [thread:$0]  (!%p1800_p13), %s1853_s30, 512, %s1862_s6, %s1866_s5, %s3152_s7, %s3152_s7, %s3151_s17  }
  0x4e   : > { %s1897_s4 = scalar_lea.hbm %s3123_s2, %s1794_s26  ;;  %s190_s25 = scalar_lea.vmem [#allocation7], %s1798_s27 }
  0x4f   : > { %s197_s11 = sshll.u32 %s190_s25, 4  ;;  %s1605_s9 = scalar_lea.hbm %s1897_s4, 512  ;;  %s1900_s11 = int_to_ptr.vmem [resolvable:$true] %s197_s11 }
  0x50   : > { %p1606_p11 = scmp.ne.s32.totalorder %s1897_s4, %s1605_s9  ;;  %s1610_s6 = scalar_lea.hbm %s3123_s2, 1024 }
  0x51   : > { %p1611_p3 = scmp.lt.u32.totalorder %s1897_s4, %s3123_s2  ;;  %p1612_p5 = scmp.lt.u32.totalorder %s1610_s6, %s1605_s9 }
  0x52   : > { %p1608_p4 = pnand %p1606_p11, %p1821_p2  ;;  %p1614_p6 = scmp.lt.u32.totalorder %s1605_s9, %s1897_s4 }
  0x53   : > { %p1613_p7 = por %p1612_p5, %p1611_p3 }
  0x54   : > { %p1609_p1 = pneg %p1608_p4 }
  0x55   : > { %p1615_p9 = por %p1614_p6, %p1613_p7 }
  0x57   : > { %p1616_p12 = pnand %p1615_p9, %p1609_p1 }
  0x59   : > { %1619 = shalt.err (!%p1616_p12)
}
  0x5a   : > { %s1620_s27 = scalar_lea.vmem %s1900_s11, 512  ;;  %s1711_s0 = smov [#allocation7]  }
  0x5b   : > { %p1621_p0 = scmp.ne.s32.totalorder %s1900_s11, %s1620_s27  ;;  %s1625_s19 = sshll.u32 %s1711_s0, 4  ;;  %s1626_s19 = int_to_ptr.vmem [resolvable:$false] %s1625_s19 }
  0x5c   : > { %s1627_s20 = scalar_lea.vmem %s1626_s19, 1024  ;;  %p1628_p11 = scmp.lt.s32.totalorder %s1900_s11, %s1626_s19 }
  0x5d   : > { %p1623_p8 = pnand %p1621_p0, %p1821_p2  ;;  %p1629_p4 = scmp.lt.s32.totalorder %s1627_s20, %s1620_s27 }
  0x5f   : > { %p1624_p10 = pneg %p1623_p8  ;;  %p1630_p3 = por %p1629_p4, %p1628_p11 }
  0x61   : > { %p1631_p5 = pnand %p1630_p3, %p1624_p10 }
  0x63   : > { %1634 = shalt.err (!%p1631_p5)
}
  0x64   : > { %1493 = dma.hbm_to_vmem [thread:$0]  (!%p1800_p13), %s1897_s4, 512, %s1900_s11, %s1815_s8, %s3152_s7, %s3152_s7, %s3151_s17  }
  0x65   : > { %p3153_p2 = scmp.ne.s32.totalorder %s3150_s29, 0 }
  0x66   : > { %s1930_s10 = sand.u32 (!%p3153_p2), 1, %s1697_s13   ;;  %p3154_p1 = scmp.ne.s32.totalorder (!%p3153_p2), %s3143_s22, 0 }
  0x67   : > { %209 = sbr.rel (%p3153_p2) target bundleno = 754 (0x2f2), region = 32  ;;  %s1393_s25 = sshll.u32 (!%p3153_p2), %s1930_s10, 5 }
  0x68   : > { %s212_s9 = scalar_lea.sflag (!%p3153_p2), [#allocation3], %s1930_s10  ;;  %s215_s30 = scalar_lea.vmem (!%p3153_p2), [#allocation2], %s1393_s25 }
  0x6e   : > { %1680 = dma.done.wait (%p3154_p1), %s212_s9, 512  }
  0x6f   : > { %1682 = vsyncadd (%p3154_p1), %s212_s9, 4294966784  ;;  %s220_s28 = sand.u32 1, %s1759_s16   ;;  %s224_s29 = scalar_lea.vmem [#allocation5], %s1393_s25 }
  0x70   : > { %s221_s8 = scalar_lea.sflag [#allocation6], %s220_s28 }
  0x71   : > { %1684 = dma.done.wait (%p3154_p1), %s221_s8, 1024  }
  0x72   : > { %1686 = vsyncadd (%p3154_p1), %s221_s8, 4294966272  ;;  %s1943_s17 = scalar_lea.vmem [#allocation7], %s1393_s25  ;;  %v1959_v5 = vld [vmem:[%s215_s30] sm:$0xff]  ;;  %v1961_v6 = vld [vmem:[%s215_s30 + $0x8] sm:$0xff]  ;;  %v416_v43 = vlaneseq  ;;  %s1712_s22 = smov 126  }
  0x73   : > { %v1946_v0 = vld [vmem:[%s1943_s17] sm:$0xff]  ;;  %v1949_v1 = vld [vmem:[%s1943_s17 + $0x8] sm:$0xff]  ;;  %v1952_v2 = vld [vmem:[%s1943_s17 + $0x10] sm:$0xff]  ;;  %s1713_s7 = smov 127   ;;  %s1714_s4 = smov 124  }
  0x74   : > { %v1955_v3 = vld [vmem:[%s1943_s17 + $0x18] sm:$0xff]  ;;  %v311_v4 = vadd.f32 %v1949_v1, %v1946_v0  ;;  %v1963_v7 = vld [vmem:[%s215_s30 + $0x10] sm:$0xff]  ;;  %v277_v9 = vmul.f32 %v1946_v0, %v1959_v5  ;;  %v278_v10 = vmul.f32 %v1949_v1, %v1961_v6  ;;  %v1971_v11 = vld [vmem:[%s224_s29] sm:$0xff]  ;;  %v2002_v44 = vand.u32 127, %v416_v43  ;;  %s1715_s11 = smov 120   ;;  %s3058_s20 = scalar_lea.vmem [#allocation8], %s1930_s10 }
  0x75   : > { %v1965_v8 = vld [vmem:[%s215_s30 + $0x18] sm:$0xff]  ;;  %v279_v13 = vmul.f32 %v1952_v2, %v1963_v7  ;;  %v1978_v15 = vld [vmem:[%s224_s29 + $0x8] sm:$0xff]  ;;  %v1980_v16 = vld [vmem:[%s224_s29 + $0x10] sm:$0xff]  ;;  %v341_v18 = vmul.f32 %v1946_v0, %v1971_v11  ;;  %p3285_p7 = scmp.ne.s32.totalorder %s3144_s23, 0 }
  0x76   : > { %v312_v12 = vadd.f32 %v311_v4, %v1952_v2  ;;  %v280_v14 = vmul.f32 %v1955_v3, %v1965_v8  ;;  %v1982_v17 = vld [vmem:[%s224_s29 + $0x18] sm:$0xff]  ;;  %v281_v19 = vmul.f32 %v277_v9, %v1959_v5  ;;  %v282_v20 = vmul.f32 %v278_v10, %v1961_v6 }
  0x77   : > { %v324_v21 = vmul.f32 %v277_v9, %v1971_v11  ;;  %v325_v22 = vmul.f32 %v278_v10, %v1978_v15  ;;  %v283_v24 = vmul.f32 %v279_v13, %v1963_v7  ;;  %v326_v26 = vmul.f32 %v279_v13, %v1980_v16 }
  0x78   : > { %v313_v23 = vadd.f32 %v312_v12, %v1955_v3  ;;  %v284_v25 = vmul.f32 %v280_v14, %v1965_v8  ;;  %v285_v27 = vadd.f32 %v282_v20, %v281_v19  ;;  %v327_v28 = vmul.f32 %v280_v14, %v1982_v17 }
  0x79   : > { %v328_v29 = vadd.f32 %v325_v22, %v324_v21  ;;  %v298_v30 = vadd.f32 %v278_v10, %v277_v9  ;;  %v342_v31 = vmul.f32 %v1949_v1, %v1978_v15  ;;  %v343_v35 = vmul.f32 %v1952_v2, %v1980_v16 }
  0x7a   : > { %314 = vadd.xlane.f32.xlu1 %v313_v23  ;;  %v286_v32 = vadd.f32 %v285_v27, %v283_v24  ;;  %v344_v40 = vmul.f32 %v1955_v3, %v1982_v17 }
  0x7b   : > { %v329_v33 = vadd.f32 %v328_v29, %v326_v26  ;;  %v299_v34 = vadd.f32 %v298_v30, %v279_v13  ;;  %v345_v36 = vadd.f32 %v342_v31, %v341_v18 }
  0x7c   : > { %v287_v37 = vadd.f32 %v286_v32, %v284_v25 }
  0x7d   : > { %v330_v38 = vadd.f32 %v329_v33, %v327_v28  ;;  %v300_v39 = vadd.f32 %v299_v34, %v280_v14  ;;  %v346_v41 = vadd.f32 %v345_v36, %v343_v35  ;;  %v2047_v35 = vshrl.u32 %v416_v43, 7 }
  0x7e   : > { %288 = vadd.xlane.f32.xlu0 %v287_v37 }
  0x7f   : > { %331 = vadd.xlane.f32.xlu1 %v330_v38  ;;  %v347_v42 = vadd.f32 %v346_v41, %v344_v40  ;;  %vm3131_vm1 = vcmp.lt.s32.totalorder %v2047_v35, 7  ;;  %vm3132_vm10 = vcmp.lt.s32.totalorder %v2047_v35, 4 }
  0x82   : > { %301 = vadd.xlane.f32.xlu0 %v300_v39  ;;  %v2050_v39 = vadd.s32 8, %v2047_v35 }
  0x84   : > { %v502_v43 = vrot.slane %v2050_v39, 1 }
  0x86   : > { %348 = vadd.xlane.f32.xlu0 %v347_v42  ;;  %v2053_v42 = vadd.s32 16, %v2047_v35 }
  0x90   : > { %439 = vrot.lane.b32.xlu1 %v2002_v44, %s1713_s7 }
  0x94   : > { %845 = vrot.lane.b32.xlu1 %v2002_v44, %s1714_s4 }
  0x98   : > { %1077 = vrot.lane.b32.xlu1 %v2002_v44, %s1715_s11 }
  0x9c   : > { %613 = vrot.lane.b32.xlu0 %v2002_v44, %s1712_s22  ;;  %431 = vrot.lane.b32.xlu1 %v1946_v0, %s1713_s7 }
  0xa0   : > { %433 = vrot.lane.b32.xlu0 %v1949_v1, %s1713_s7  ;;  %605 = vrot.lane.b32.xlu1 %v1946_v0, %s1712_s22 }
  0xa4   : > { %435 = vrot.lane.b32.xlu0 %v1952_v2, %s1713_s7  ;;  %837 = vrot.lane.b32.xlu1 %v1946_v0, %s1714_s4 }
  0xa8   : > { %607 = vrot.lane.b32.xlu0 %v1949_v1, %s1712_s22  ;;  %1069 = vrot.lane.b32.xlu1 %v1946_v0, %s1715_s11 }
  0xac   : > { %437 = vrot.lane.b32.xlu0 %v1955_v3, %s1713_s7 }
  0xb0   : > { %609 = vrot.lane.b32.xlu0 %v1952_v2, %s1712_s22 }
  0xb4   : > { %839 = vrot.lane.b32.xlu0 %v1949_v1, %s1714_s4 }
  0xb8   : > { %611 = vrot.lane.b32.xlu0 %v1955_v3, %s1712_s22 }
  0xbc   : > { %841 = vrot.lane.b32.xlu0 %v1952_v2, %s1714_s4 }
  0xc0   : > { %1071 = vrot.lane.b32.xlu0 %v1949_v1, %s1715_s11 }
  0xc4   : > { %843 = vrot.lane.b32.xlu0 %v1955_v3, %s1714_s4 }
  0xc8   : > { %1073 = vrot.lane.b32.xlu0 %v1952_v2, %s1715_s11 }
 0x107   : > { %v315_v45 = vpop.xlane.xlu1 %314 }
 0x108   : > { %v316_v46 = vrot.slane %v315_v45, 4 }
 0x10a   : > { %v317_v47 = vadd.f32 %v316_v46, %v315_v45  ;;  %v2056_v45 = vadd.s32 24, %v2047_v35  ;;  %v501_v46 = vrot.slane %v2047_v35, 1 }
 0x10b   : > { %v289_v48 = vpop.xlane.xlu0 %288 }
 0x10c   : > { %v332_v49 = vpop.xlane.xlu1 %331  ;;  %v290_v50 = vrot.slane %v289_v48, 4  ;;  %v318_v54 = vrot.slane %v317_v47, 2 }
 0x10d   : > { %v333_v51 = vrot.slane %v332_v49, 4 }
 0x10e   : > { %v291_v52 = vadd.f32 %v290_v50, %v289_v48  ;;  %v319_v63 = vadd.f32 %v318_v54, %v317_v47  ;;  %v504_v50 = vrot.slane %v2056_v45, 1  ;;  %v507_v54 = vsel %vm3131_vm1, %v501_v46, %v502_v43 }
 0x10f   : > { %v334_v53 = vadd.f32 %v333_v51, %v332_v49  ;;  %v302_v55 = vpop.xlane.xlu0 %301  ;;  %v503_v49 = vrot.slane %v2053_v42, 1  ;;  %vm509_vm2 = vcmp.lt.s32.totalorder %v2047_v35, %v507_v54  ;;  %vm517_vm6 = vcmp.gt.s32.totalorder %v2047_v35, %v507_v54 }
 0x110   : > { %v292_v56 = vrot.slane %v291_v52, 2  ;;  %v303_v58 = vrot.slane %v302_v55, 4  ;;  %v320_v19 = vrot.slane %v319_v63, 1 }
 0x111   : > { %v335_v57 = vrot.slane %v334_v53, 2 }
 0x112   : > { %v304_v59 = vadd.f32 %v303_v58, %v302_v55  ;;  %v293_v60 = vadd.f32 %v292_v56, %v291_v52  ;;  %v321_v25 = vadd.f32 %v320_v19, %v319_v63  ;;  %v505_v58 = vsel %vm3131_vm1, %v503_v49, %v504_v50 }
 0x113   : > { %v336_v61 = vadd.f32 %v335_v57, %v334_v53  ;;  %v349_v62 = vpop.xlane.xlu0 %348  ;;  %v506_v57 = vsel %vm3131_vm1, %v502_v43, %v503_v49  ;;  %vm513_vm4 = vcmp.lt.s32.totalorder %v2053_v42, %v505_v58  ;;  %vm521_vm8 = vcmp.gt.s32.totalorder %v2053_v42, %v505_v58 }
 0x114   : > { %v305_v4 = vrot.slane %v304_v59, 2  ;;  %v350_v9 = vrot.slane %v349_v62, 4  ;;  %v294_v10 = vrot.slane %v293_v60, 1  ;;  %vm511_vm3 = vcmp.lt.s32.totalorder %v2050_v39, %v506_v57 }
 0x115   : > { %v337_v18 = vrot.slane %v336_v61, 1  ;;  %vm519_vm7 = vcmp.gt.s32.totalorder %v2050_v39, %v506_v57 }
 0x116   : > { %v351_v12 = vadd.f32 %v350_v9, %v349_v62  ;;  %v295_v13 = vadd.f32 %v294_v10, %v293_v60  ;;  %v306_v14 = vadd.f32 %v305_v4, %v304_v59  ;;  %v508_v59 = vsel %vm3131_vm1, %v504_v50, %v501_v46 }
 0x117   : > { %v338_v23 = vadd.f32 %v337_v18, %v336_v61  ;;  %v920_v61 = vrot.slane %v2047_v35, 4  ;;  %v921_v62 = vrot.slane %v2050_v39, 4  ;;  %vm515_vm5 = vcmp.lt.s32.totalorder %v2056_v45, %v508_v59 }
 0x118   : > { %v352_v20 = vrot.slane %v351_v12, 2  ;;  %1442 = vpush %v295_v13  ;;  %v307_v21 = vrot.slane %v306_v14, 1  ;;  %v512_v18 = vsel %vm511_vm3, %v2050_v39, %v506_v57  ;;  %vm523_vm9 = vcmp.gt.s32.totalorder %v2056_v45, %v508_v59 }
 0x11a   : > { %v308_v22 = vadd.f32 %v307_v21, %v306_v14  ;;  %v353_v24 = vadd.f32 %v352_v20, %v351_v12  ;;  %v495_v21 = vrot.slane %v1952_v2, 1 }
 0x11c   : > { %1444 = vpush %v308_v22  ;;  %v354_v26 = vrot.slane %v353_v24, 1 }
 0x11d   : > { %1446 = vpush %v321_v25 }
 0x11e   : > { %1448 = vpush %v338_v23  ;;  %v355_v27 = vadd.f32 %v354_v26, %v353_v24  ;;  %v518_v23 = vsel %vm517_vm6, %v2047_v35, %v507_v54  ;;  %v520_v24 = vsel %vm519_vm7, %v2050_v39, %v506_v57 }
 0x11f   : > { %vm533_vm11 = vcmp.lt.s32.totalorder %v518_v23, 32  ;;  %vm534_vm14 = vcmp.lt.s32.totalorder %v520_v24, 32 }
 0x120   : > { %1450 = vpush %v355_v27  ;;  %v516_v27 = vsel %vm515_vm5, %v2056_v45, %v508_v59 }
 0x149   : > { %s1443_s6 = spop %1442 }
 0x14a   : > { %v297_v29 = vstv %s1443_s6  ;;  %s1271_s6 = sshll.u32 %s3058_s20, 4  ;;  %s3077_s6 = int_to_ptr.vmem [resolvable:$true] %s1271_s6 }
 0x14d   : > { %s1445_s5 = spop %1444 }
 0x14e   : > { %v310_v28 = vstv %s1445_s5  ;;  %s1447_s26 = spop %1446 }
 0x14f   : > { %v359_v30 = vmul.f32 %v310_v28, %v310_v28  ;;  %v2042_v31 = vstv %s1447_s26  ;;  %s1449_s27 = spop %1448  ;;  %v369_v37 = vsub.f32 0.0, %v310_v28 }
 0x150   : > { %v358_v32 = vmul.f32 %v2042_v31, %v297_v29  ;;  %v340_v38 = vstv %s1449_s27 }
 0x151   : > { %s1451_s0 = spop %1450  ;;  %v363_v47 = vmul.f32 %v340_v38, %v2042_v31  ;;  %v370_v48 = vmul.f32 %v369_v37, %v340_v38 }
 0x152   : > { %v360_v33 = vsub.f32 %v358_v32, %v359_v30  ;;  %v357_v36 = vstv %s1451_s0  ;;  %v526_v30 = vsub.s32 %v520_v24, %v512_v18  ;;  %v922_v32 = vrot.slane %v2053_v42, 4 }
 0x153   : > { %v364_v40 = vmul.f32 %v357_v36, %v310_v28  ;;  %v371_v41 = vmul.f32 %v357_v36, %v297_v29  ;;  %v522_v28 = vsel %vm521_vm8, %v2053_v42, %v505_v58 }
 0x154   : > { %vm361_vm0 = vcmp.ne.f32.partialorder %v360_v33, 0.0  ;;  %vm2144_vm13 = vcmp.eq.s32.totalorder %v526_v30, 1  ;;  %v925_v49 = vsel %vm3132_vm10, %v921_v62, %v922_v32 }
 0x155   : > { %v362_v34 = vsel %vm361_vm0, %v360_v33, 1.0  ;;  %v365_v51 = vsub.f32 %v363_v47, %v364_v40  ;;  %v372_v52 = vadd.f32 %v371_v41, %v370_v48  ;;  %v926_v41 = vsel %vm3132_vm10, %v920_v61, %v921_v62 }
 0x156   : > { %1539 = vrcp.f32 %v362_v34  ;;  %v595_v34 = vand.u32 1, %v2002_v44  ;;  %vm928_vm15 = vcmp.lt.s32.totalorder %v2047_v35, %v926_v41  ;;  %vm930_vm7 = vcmp.lt.s32.totalorder %v2050_v39, %v925_v49 }
 0x157   : > { %vm938_vm8 = vcmp.gt.s32.totalorder %v2050_v39, %v925_v49 }
 0x160   : > { %v1540_v53 = vpop.eup %1539 }
 0x161   : > { %v367_v55 = vmul.f32 %v1540_v53, %v365_v51  ;;  %v373_v56 = vmul.f32 %v1540_v53, %v372_v52  ;;  %v915_v53 = vrot.slane %v1955_v3, 4 }
 0x163   : > { %v368_v60 = vsel %vm361_vm0, %v367_v55, 0.0  ;;  %v374_v10 = vsel %vm361_vm0, %v373_v56, 0.0 }
 0x164   : > { %v375_v63 = vmul.f32 %v368_v60, %v1959_v5  ;;  %v376_v4 = vmul.f32 %v368_v60, %v1961_v6  ;;  %v377_v9 = vmul.f32 %v368_v60, %v1963_v7  ;;  %v493_v5 = vrot.slane %v1946_v0, 1 }
 0x165   : > { %v494_v6 = vrot.slane %v1949_v1, 1  ;;  %v510_v7 = vsel %vm509_vm2, %v2047_v35, %v507_v54  ;;  %v378_v22 = vmul.f32 %v368_v60, %v1965_v8  ;;  %v514_v8 = vsel %vm513_vm4, %v2053_v42, %v505_v58 }
 0x166   : > { %v379_v12 = vadd.f32 %v375_v63, %v374_v10  ;;  %v380_v13 = vadd.f32 %v376_v4, %v374_v10  ;;  %v381_v14 = vadd.f32 %v377_v9, %v374_v10  ;;  %v525_v29 = vsub.s32 %v518_v23, %v510_v7 }
 0x167   : > { %v382_v33 = vadd.f32 %v378_v22, %v374_v10  ;;  %v499_v36 = vsel %vm3131_vm1, %v493_v5, %v494_v6  ;;  %v527_v40 = vsub.s32 %v522_v28, %v514_v8  ;;  %v498_v46 = vsel %vm3131_vm1, %v494_v6, %v495_v21 }
 0x168   : > { %v383_v19 = vsub.f32 %v379_v12, %v1971_v11  ;;  %v384_v20 = vsub.f32 %v380_v13, %v1978_v15  ;;  %v385_v25 = vsub.f32 %v381_v14, %v1980_v16  ;;  %v496_v15 = vrot.slane %v1955_v3, 1 }
 0x169   : > { %v2120_v16 = vsel %vm523_vm9, %v2056_v45, %v508_v59  ;;  %vm529_vm12 = vcmp.eq.s32.totalorder %v525_v29, 1  ;;  %v386_v50 = vsub.f32 %v382_v33, %v1982_v17  ;;  %vm2152_vm0 = vcmp.eq.s32.totalorder %v527_v40, 1  ;;  %vm2180_vm9 = vmand %vm2144_vm13, %vm534_vm14 }
 0x16a   : > { %v2101_v26 = vmul.f32 %v383_v19, %v1946_v0  ;;  %v2104_v11 = vmul.f32 %v384_v20, %v1949_v1  ;;  %v2127_v37 = vmul.f32 %v385_v25, %v1952_v2  ;;  %v497_v38 = vsel %vm3131_vm1, %v495_v21, %v496_v15  ;;  %vm2163_vm6 = vmand %vm529_vm12, %vm533_vm11 }
 0x16b   : > { %v500_v43 = vsel %vm3131_vm1, %v496_v15, %v493_v5  ;;  %v528_v47 = vsub.s32 %v2120_v16, %v516_v27  ;;  %v391_v51 = vmul.f32 %v383_v19, %v383_v19  ;;  %v392_v52 = vmul.f32 %v384_v20, %v384_v20 }
 0x16c   : > { %425 = vrot.lane.b32.xlu0 %v2104_v11, %s1713_s7  ;;  %423 = vrot.lane.b32.xlu1 %v2101_v26, %s1713_s7  ;;  %vm535_vm2 = vcmp.lt.s32.totalorder %v522_v28, 32  ;;  %vm536_vm3 = vcmp.lt.s32.totalorder %v2120_v16, 32  ;;  %vm936_vm4 = vcmp.gt.s32.totalorder %v2047_v35, %v926_v41  ;;  %v541_v55 = vmul.f32 %v499_v36, %v1946_v0 }
 0x16d   : > { %vm2158_vm5 = vcmp.eq.s32.totalorder %v528_v47, 1  ;;  %v542_v56 = vmul.f32 %v498_v46, %v1949_v1  ;;  %v393_v57 = vmul.f32 %v385_v25, %v385_v25  ;;  %v923_v58 = vrot.slane %v2056_v45, 4  ;;  %vm539_vm11 = vmand %vm2152_vm0, %vm535_vm2 }
 0x16e   : > { %v929_v59 = vsel %vm928_vm15, %v2047_v35, %v926_v41  ;;  %v2185_v62 = vsel %vm936_vm4, %v2047_v35, %v926_v41  ;;  %v394_v63 = vmul.f32 %v386_v50, %v386_v50  ;;  %v395_v4 = vmul.f32 %v391_v51, %v1946_v0  ;;  %vm540_vm15 = vmand %vm2158_vm5, %vm536_vm3 }
 0x16f   : > { %v396_v9 = vmul.f32 %v392_v52, %v1949_v1  ;;  %v2190_v10 = vmul.f32 %v386_v50, %v1955_v3  ;;  %v543_v12 = vmul.f32 %v497_v38, %v1952_v2  ;;  %v544_v13 = vmul.f32 %v500_v43, %v1955_v3 }
 0x170   : > { %599 = vrot.lane.b32.xlu0 %v2104_v11, %s1712_s22  ;;  %427 = vrot.lane.b32.xlu1 %v2127_v37, %s1713_s7  ;;  %v1716_v14 = vmov 0.0   ;;  %v931_v6 = vsel %vm930_vm7, %v2050_v39, %v925_v49  ;;  %v2199_v7 = vsel %vm938_vm8, %v2050_v39, %v925_v49  ;;  %v397_v18 = vmul.f32 %v393_v57, %v1952_v2 }
 0x171   : > { %v1397_v5 = vsel %vm2163_vm6, 1.0, %v1716_v14  ;;  %v399_v19 = vadd.f32 %v396_v9, %v395_v4  ;;  %v1398_v20 = vsel %vm2180_vm9, 1.0, %v1716_v14  ;;  %v924_v21 = vsel %vm3132_vm10, %v922_v32, %v923_v58 }
 0x172   : > { %v944_v22 = vsub.s32 %v2185_v62, %v929_v59  ;;  %v952_v23 = vand.u32 3, %v929_v59  ;;  %v2215_v24 = vmul.f32 %v1397_v5, %v541_v55  ;;  %v827_v25 = vand.u32 3, %v2002_v44 }
 0x173   : > { %v398_v15 = vmul.f32 %v394_v63, %v1955_v3  ;;  %v400_v8 = vadd.f32 %v399_v19, %v397_v18  ;;  %vm2219_vm12 = vcmp.eq.s32.totalorder %v595_v34, 0  ;;  %v3165_v27 = vmov 0 }
 0x174   : > { %831 = vrot.lane.b32.xlu0 %v2104_v11, %s1714_s4  ;;  %597 = vrot.lane.b32.xlu1 %v2101_v26, %s1712_s22  ;;  %v3166_v27 = vsel %vm2219_vm12, 4294967295, %v3165_v27  ;;  %v912_v28 = vrot.slane %v1946_v0, 4  ;;  %v927_v29 = vsel %vm3132_vm10, %v923_v58, %v920_v61  ;;  %v945_v30 = vsub.s32 %v2199_v7, %v931_v6 }
 0x175   : > { %v953_v32 = vand.u32 3, %v931_v6  ;;  %v1399_v33 = vsel %vm539_vm11, 1.0, %v1716_v14  ;;  %vm932_vm13 = vcmp.lt.s32.totalorder %v2053_v42, %v924_v21  ;;  %vm940_vm14 = vcmp.gt.s32.totalorder %v2053_v42, %v924_v21 }
 0x176   : > { %v2232_v34 = vadd.f32 %v400_v8, %v398_v15  ;;  %v587_v36 = vand.u32 1, %v2047_v35  ;;  %v2243_v61 = vmul.f32 %v1398_v20, %v542_v56  ;;  %vm2245_vm0 = vcmp.eq.s32.totalorder %v944_v22, 4 }
 0x177   : > { %vm2249_vm2 = vcmp.eq.s32.totalorder %v952_v23, 0  ;;  %v588_v41 = vand.u32 1, %v2050_v39  ;;  %v913_v46 = vrot.slane %v1949_v1, 4  ;;  %vm934_vm4 = vcmp.lt.s32.totalorder %v2056_v45, %v927_v29 }
 0x178   : > { %1063 = vrot.lane.b32.xlu0 %v2104_v11, %s1715_s11  ;;  %429 = vrot.lane.b32.xlu1 %v2190_v10, %s1713_s7  ;;  %vm942_vm6 = vcmp.gt.s32.totalorder %v2056_v45, %v927_v29  ;;  %v933_v16 = vsel %vm932_vm13, %v2053_v42, %v924_v21  ;;  %v2259_v43 = vsel %vm940_vm14, %v2053_v42, %v924_v21  ;;  %vm2261_vm3 = vcmp.eq.s32.totalorder %v945_v30, 4  ;;  %vm960_vm7 = vmand %vm2245_vm0, %vm2249_vm2 }
 0x179   : > { %vm2265_vm5 = vcmp.eq.s32.totalorder %v953_v32, 0  ;;  %v1400_v49 = vsel %vm540_vm15, 1.0, %v1716_v14  ;;  %v2270_v50 = vmul.f32 %v1399_v33, %v543_v12  ;;  %v914_v51 = vrot.slane %v1952_v2, 4 }
 0x17a   : > { %vm964_vm8 = vcmp.lt.s32.totalorder %v2185_v62, 32  ;;  %vm2280_vm9 = vcmp.eq.s32.totalorder %v587_v36, 0  ;;  %v3175_v52 = vmov 0  ;;  %v935_v54 = vsel %vm934_vm4, %v2056_v45, %v927_v29  ;;  %vm961_vm14 = vmand %vm2261_vm3, %vm2265_vm5 }
 0x17b   : > { %v3176_v52 = vsel %vm2280_vm9, 4294967295, %v3175_v52  ;;  %v2287_v17 = vsel %vm942_vm6, %v2056_v45, %v927_v29  ;;  %v589_v55 = vand.u32 1, %v2053_v42  ;;  %vm2290_vm11 = vcmp.eq.s32.totalorder %v588_v41, 0  ;;  %vm2315_vm15 = vmand %vm960_vm7, %vm964_vm8 }
 0x17c   : > { %1075 = vrot.lane.b32.xlu0 %v1955_v3, %s1715_s11  ;;  %601 = vrot.lane.b32.xlu1 %v2127_v37, %s1712_s22  ;;  %v3177_v56 = vmov 0  ;;  %vm2294_vm13 = vcmp.eq.s32.totalorder %v827_v25, 0  ;;  %v946_v58 = vsub.s32 %v2259_v43, %v933_v16  ;;  %v484_v59 = vrot.slane %v2101_v26, 1  ;;  %vm785_vm4 = vmand %vm2280_vm9, %vm2219_vm12 }
 0x17d   : > { %v3178_v56 = vsel %vm2290_vm11, 4294967295, %v3177_v56  ;;  %v485_v60 = vrot.slane %v2104_v11, 1  ;;  %v486_v63 = vrot.slane %v2127_v37, 1  ;;  %v2306_v4 = vmul.f32 %v1400_v49, %v544_v13  ;;  %vm786_vm0 = vmand %vm2290_vm11, %vm2219_vm12 }
 0x17e   : > { %v917_v12 = vsel %vm3132_vm10, %v913_v46, %v914_v51  ;;  %v947_v13 = vsub.s32 %v2287_v17, %v935_v54  ;;  %v954_v62 = vand.u32 3, %v933_v16  ;;  %vm965_vm6 = vcmp.lt.s32.totalorder %v2199_v7, 32 }
 0x17f   : > { %v2335_v5 = vsel %vm3132_vm10, %v914_v51, %v915_v53  ;;  %v918_v6 = vsel %vm3132_vm10, %v912_v28, %v913_v46  ;;  %v2341_v18 = vsel %vm3132_vm10, %v915_v53, %v912_v28  ;;  %v955_v19 = vand.u32 3, %v935_v54  ;;  %vm2368_vm8 = vmand %vm961_vm14, %vm965_vm6 }
 0x180   : > { %829 = vrot.lane.b32.xlu1 %v2101_v26, %s1714_s4  ;;  %v590_v20 = vand.u32 1, %v2056_v45  ;;  %vm2344_vm2 = vcmp.eq.s32.totalorder %v589_v55, 0  ;;  %v3183_v21 = vmov 0  ;;  %v903_v22 = vrot.slane %v2101_v26, 4 }
 0x181   : > { %v3184_v21 = vsel %vm2344_vm2, 4294967295, %v3183_v21  ;;  %vm2349_vm7 = vcmp.eq.s32.totalorder %v946_v58, 4  ;;  %v490_v25 = vsel %vm3131_vm1, %v485_v60, %v486_v63  ;;  %v491_v15 = vsel %vm3131_vm1, %v484_v59, %v485_v60 }
 0x182   : > { %v904_v8 = vrot.slane %v2104_v11, 4  ;;  %v905_v28 = vrot.slane %v2127_v37, 4  ;;  %v1409_v30 = vsel %vm785_vm4, 1.0, %v1716_v14  ;;  %v1410_v32 = vsel %vm786_vm0, 1.0, %v1716_v14  ;;  %vm3199_vm0 = vmand %vm2344_vm2, %vm2219_vm12 }
 0x183   : > { %vm2379_vm1 = vcmp.eq.s32.totalorder %v947_v13, 4  ;;  %vm2383_vm10 = vcmp.eq.s32.totalorder %v954_v62, 0  ;;  %v487_v36 = vrot.slane %v2190_v10, 1  ;;  %vm2398_vm14 = vcmp.eq.s32.totalorder %v955_v19, 0 }
 0x184   : > { %603 = vrot.lane.b32.xlu1 %v2190_v10, %s1712_s22  ;;  %v976_v40 = vmul.f32 %v918_v6, %v1946_v0  ;;  %vm2404_vm6 = vcmp.eq.s32.totalorder %v590_v20, 0  ;;  %v3195_v41 = vmov 0  ;;  %v557_v46 = vsub.f32 %v491_v15, %v2101_v26  ;;  %vm962_vm5 = vmand %vm2349_vm7, %vm2383_vm10 }
 0x185   : > { %v3196_v41 = vsel %vm2404_vm6, 4294967295, %v3195_v41  ;;  %v558_v16 = vsub.f32 %v490_v25, %v2104_v11  ;;  %v977_v47 = vmul.f32 %v917_v12, %v1949_v1  ;;  %v797_v48 = vmul.f32 %v1409_v30, %v1946_v0  ;;  %vm788_vm10 = vmand %vm2404_vm6, %vm2219_vm12 }
 0x186   : > { %v798_v49 = vmul.f32 %v1410_v32, %v1949_v1  ;;  %vm3197_vm4 = vcmp.lt.s32.totalorder %v2047_v35, 4  ;;  %v1411_v54 = vsel %vm3199_vm0, 1.0, %v1716_v14  ;;  %vm3134_vm9 = vcmp.lt.s32.totalorder %v2047_v35, 6 }
 0x187   : > { %v909_v51 = vsel %vm3197_vm4, %v904_v8, %v905_v28  ;;  %vm3198_vm3 = vmmov %vm3197_vm4  ;;  %v688_v55 = vrot.slane %v2047_v35, 2  ;;  %v689_v58 = vrot.slane %v2050_v39, 2  ;;  %vm3200_vm7 = vcmp.lt.s32.totalorder %v2047_v35, 7 }
 0x188   : > { %833 = vrot.lane.b32.xlu1 %v2127_v37, %s1714_s4  ;;  %v910_v53 = vsel %vm3198_vm3, %v903_v22, %v904_v8  ;;  %v489_v60 = vsel %vm3200_vm7, %v486_v63, %v487_v36  ;;  %v906_v12 = vrot.slane %v2190_v10, 4  ;;  %vm3201_vm3 = vmand %vm2315_vm15, %vm2294_vm13  ;;  %v561_v6 = vand.u32 2147483647, %v557_v46  ;;  %v2536_v63 = vpop.permute.xlu0 %613 }
 0x189   : > { %v1417_v13 = vsel %vm3201_vm3, 1.0, %v1716_v14  ;;  %vm3202_vm4 = vmand %vm2368_vm8, %vm2294_vm13  ;;  %v562_v19 = vand.u32 2147483647, %v558_v16  ;;  %vm3203_vm0 = vcmp.lt.s32.totalorder %v2259_v43, 32  ;;  %v992_v9 = vsub.f32 %v910_v53, %v2101_v26 }
 0x18a   : > { %v1418_v62 = vsel %vm3202_vm4, 1.0, %v1716_v14  ;;  %vm2459_vm7 = vmand %vm962_vm5, %vm3203_vm0  ;;  %v993_v20 = vsub.f32 %v909_v51, %v2104_v11  ;;  %v799_v23 = vmul.f32 %v1411_v54, %v1952_v2  ;;  %v801_v25 = vadd.f32 %v798_v49, %v797_v48 }
 0x18b   : > { %vm967_vm15 = vcmp.lt.s32.totalorder %v2287_v17, 32  ;;  %v690_v15 = vrot.slane %v2053_v42, 2  ;;  %v1412_v8 = vsel %vm788_vm10, 1.0, %v1716_v14  ;;  %v559_v29 = vsub.f32 %v489_v60, %v2127_v37  ;;  %vm963_vm8 = vmand %vm2379_vm1, %vm2398_vm14 }
 0x18c   : > { %1061 = vrot.lane.b32.xlu1 %v2101_v26, %s1715_s11  ;;  %v691_v43 = vrot.slane %v2056_v45, 2  ;;  %v694_v30 = vsel %vm3134_vm9, %v688_v55, %v689_v58  ;;  %vm3206_vm5 = vcmp.lt.s32.totalorder %v2047_v35, 7  ;;  %vm3207_vm10 = vcmp.lt.s32.totalorder %v2047_v35, 4  ;;  %vm974_vm3 = vmand %vm2459_vm7, %vm2294_vm13 }
 0x18d   : > { %v492_v32 = vsel %vm3206_vm5, %v487_v36, %v484_v59  ;;  %v908_v33 = vsel %vm3207_vm10, %v905_v28, %v906_v12  ;;  %v988_v46 = vmul.f32 %v1417_v13, %v976_v40  ;;  %v989_v16 = vmul.f32 %v1418_v62, %v977_v47  ;;  %vm2501_vm4 = vmand %vm963_vm8, %vm967_vm15  ;;  %v2554_v59 = vpop.permute.xlu0 %433 }
 0x18e   : > { %v565_v48 = vmul.f32 %v561_v6, %v2215_v24  ;;  %v566_v49 = vmul.f32 %v562_v19, %v2243_v61  ;;  %v996_v51 = vand.u32 2147483647, %v992_v9  ;;  %v997_v53 = vand.u32 2147483647, %v993_v20  ;;  %vm3210_vm1 = vmmov %vm3207_vm10 }
 0x18f   : > { %v800_v54 = vmul.f32 %v1412_v8, %v1955_v3  ;;  %v802_v60 = vadd.f32 %v801_v25, %v799_v23  ;;  %v978_v24 = vmul.f32 %v2335_v5, %v1952_v2  ;;  %v693_v61 = vsel %vm3134_vm9, %v689_v58, %v690_v15  ;;  %vm975_vm0 = vmand %vm2501_vm4, %vm2294_vm13 }
 0x190   : > { %835 = vrot.lane.b32.xlu1 %v2190_v10, %s1714_s4  ;;  %v560_v28 = vsub.f32 %v492_v32, %v2190_v10  ;;  %v563_v36 = vand.u32 2147483647, %v559_v29  ;;  %v1419_v17 = vsel %vm974_vm3, 1.0, %v1716_v14  ;;  %v994_v7 = vsub.f32 %v908_v33, %v2127_v37  ;;  %s1436_s4 = sshll.u32 %s1759_s16, 4  ;;  %s1259_s16 = scalar_lea.sflag [#allocation4], %s1930_s10 }
 0x191   : > { %v911_v38 = vsel %vm3210_vm1, %v906_v12, %v903_v22  ;;  %v979_v5 = vmul.f32 %v2341_v18, %v1955_v3  ;;  %v692_v40 = vsel %vm3134_vm9, %v690_v15, %v691_v43  ;;  %vm696_vm14 = vcmp.lt.s32.totalorder %v2047_v35, %v694_v30  ;;  %s3075_s27 = scalar_lea.hbm %s3124_s3, %s1436_s4 }
 0x192   : > { %v569_v47 = vadd.f32 %v566_v49, %v565_v48  ;;  %v1000_v58 = vmul.f32 %v996_v51, %v988_v46  ;;  %v1001_v13 = vmul.f32 %v997_v53, %v989_v16  ;;  %vm698_vm7 = vcmp.lt.s32.totalorder %v2050_v39, %v693_v61 }
 0x193   : > { %v803_v22 = vadd.f32 %v802_v60, %v800_v54  ;;  %v990_v12 = vmul.f32 %v1419_v17, %v978_v24  ;;  %vm704_vm15 = vcmp.gt.s32.totalorder %v2047_v35, %v694_v30  ;;  %vm706_vm8 = vcmp.gt.s32.totalorder %v2050_v39, %v693_v61 }
 0x194   : > { %1065 = vrot.lane.b32.xlu1 %v2127_v37, %s1715_s11  ;;  %v564_v18 = vand.u32 2147483647, %v560_v28  ;;  %v567_v62 = vmul.f32 %v563_v36, %v2270_v50  ;;  %v995_v6 = vsub.f32 %v911_v38, %v2190_v10  ;;  %v998_v19 = vand.u32 2147483647, %v994_v7 }
 0x195   : > { %v1420_v9 = vsel %vm975_vm0, 1.0, %v1716_v14  ;;  %v697_v20 = vsel %vm696_vm14, %v2047_v35, %v694_v30  ;;  %vm700_vm5 = vcmp.lt.s32.totalorder %v2053_v42, %v692_v40  ;;  %v1004_v25 = vadd.f32 %v1001_v13, %v1000_v58  ;;  %v2596_v13 = vpop.permute.xlu0 %435 }
 0x196   : > { %v570_v23 = vadd.f32 %v569_v47, %v567_v62  ;;  %v705_v50 = vsel %vm704_vm15, %v2047_v35, %v694_v30  ;;  %vm708_vm10 = vcmp.gt.s32.totalorder %v2053_v42, %v692_v40  ;;  %v699_v15 = vsel %vm698_vm7, %v2050_v39, %v693_v61 }
 0x197   : > { %v707_v8 = vsel %vm706_vm8, %v2050_v39, %v693_v61  ;;  %v568_v29 = vmul.f32 %v564_v18, %v2306_v4  ;;  %v991_v32 = vmul.f32 %v1420_v9, %v979_v5  ;;  %v999_v33 = vand.u32 2147483647, %v995_v6 }
 0x198   : > { %1067 = vrot.lane.b32.xlu1 %v2190_v10, %s1715_s11  ;;  %v1002_v46 = vmul.f32 %v998_v19, %v990_v12  ;;  %v701_v16 = vsel %vm700_vm5, %v2053_v42, %v692_v40  ;;  %v2552_v48 = vsel %vm708_vm10, %v2053_v42, %v692_v40  ;;  %v712_v30 = vsub.s32 %v705_v50, %v697_v20 }
 0x199   : > { %v720_v49 = vand.u32 1, %v697_v20  ;;  %v571_v51 = vadd.f32 %v570_v23, %v568_v29  ;;  %v713_v54 = vsub.s32 %v707_v8, %v699_v15  ;;  %v721_v60 = vand.u32 1, %v699_v15 }
 0x19a   : > { %v1005_v53 = vadd.f32 %v1004_v25, %v1002_v46  ;;  %v820_v24 = vand.u32 3, %v2050_v39  ;;  %v1003_v4 = vmul.f32 %v999_v33, %v991_v32  ;;  %v819_v61 = vand.u32 3, %v2047_v35 }
 0x19b   : > { %804 = vadd.xlane.f32.xlu0 %v803_v22  ;;  %v695_v28 = vsel %vm3134_vm9, %v691_v43, %v688_v55  ;;  %v714_v36 = vsub.s32 %v2552_v48, %v701_v16  ;;  %vm2565_vm3 = vcmp.eq.s32.totalorder %v712_v30, 2  ;;  %v722_v7 = vand.u32 1, %v701_v16  ;;  %v2660_v30 = vpop.permute.xlu0 %607 }
 0x19c   : > { %vm2569_vm4 = vcmp.eq.s32.totalorder %v720_v49, 0  ;;  %v1006_v5 = vadd.f32 %v1005_v53, %v1003_v4  ;;  %vm2573_vm1 = vcmp.eq.s32.totalorder %v713_v54, 2  ;;  %vm2577_vm14 = vcmp.eq.s32.totalorder %v721_v60, 0 }
 0x19d   : > { %vm2581_vm0 = vcmp.eq.s32.totalorder %v820_v24, 0  ;;  %v821_v43 = vand.u32 3, %v2053_v42  ;;  %vm2586_vm7 = vcmp.eq.s32.totalorder %v819_v61, 0  ;;  %v3221_v58 = vmov 0 }
 0x19e   : > { %v3222_v58 = vsel %vm2586_vm7, 4294967295, %v3221_v58  ;;  %vm702_vm15 = vcmp.lt.s32.totalorder %v2056_v45, %v695_v28  ;;  %vm710_vm8 = vcmp.gt.s32.totalorder %v2056_v45, %v695_v28  ;;  %vm2598_vm10 = vcmp.eq.s32.totalorder %v714_v36, 2  ;;  %vm1017_vm11 = vmand %vm2586_vm7, %vm2294_vm13 }
 0x19f   : > { %572 = vadd.xlane.f32.xlu0 %v571_v51  ;;  %vm2602_vm9 = vcmp.eq.s32.totalorder %v722_v7, 0  ;;  %v680_v18 = vrot.slane %v1946_v0, 2  ;;  %v681_v62 = vrot.slane %v1949_v1, 2  ;;  %v682_v6 = vrot.slane %v1952_v2, 2  ;;  %vm3232_vm12 = vmand %vm2581_vm0, %vm2294_vm13  ;;  %v2724_v57 = vpop.permute.xlu0 %437 }
 0x1a0   : > { %vm732_vm2 = vcmp.lt.s32.totalorder %v705_v50, 32  ;;  %v822_v19 = vand.u32 3, %v2056_v45  ;;  %v703_v9 = vsel %vm702_vm15, %v2056_v45, %v695_v28  ;;  %v711_v20 = vsel %vm710_vm8, %v2056_v45, %v695_v28  ;;  %vm730_vm7 = vmand %vm2598_vm10, %vm2602_vm9 }
 0x1a1   : > { %vm733_vm6 = vcmp.lt.s32.totalorder %v707_v8, 32  ;;  %vm2624_vm5 = vcmp.eq.s32.totalorder %v821_v43, 0  ;;  %v671_v25 = vrot.slane %v2101_v26, 2  ;;  %v672_v50 = vrot.slane %v2104_v11, 2  ;;  %vm3229_vm15 = vmand %vm2565_vm3, %vm2569_vm4 }
 0x1a2   : > { %v673_v15 = vrot.slane %v2127_v37, 2  ;;  %vm2640_vm8 = vmand %vm3229_vm15, %vm732_vm2  ;;  %v1422_v29 = vsel %vm3232_vm12, 1.0, %v1716_v14  ;;  %v1421_v32 = vsel %vm1017_vm11, 1.0, %v1716_v14  ;;  %v715_v33 = vsub.s32 %v711_v20, %v703_v9 }
 0x1a3   : > { %1007 = vadd.xlane.f32.xlu0 %v1006_v5  ;;  %v723_v46 = vand.u32 1, %v703_v9  ;;  %vm3233_vm3 = vmand %vm2573_vm1, %vm2577_vm14  ;;  %vm3236_vm11 = vcmp.lt.s32.totalorder %v2047_v35, 6  ;;  %vm2668_vm4 = vcmp.eq.s32.totalorder %v822_v19, 0  ;;  %vm3242_vm15 = vnez %v3166_v27 }
 0x1a4   : > { %vm2656_vm2 = vmand %vm3233_vm3, %vm733_vm6  ;;  %v685_v49 = vsel %vm3236_vm11, %v681_v62, %v682_v6  ;;  %v1029_v24 = vmul.f32 %v1421_v32, %v1946_v0  ;;  %v1030_v4 = vmul.f32 %v1422_v29, %v1949_v1  ;;  %v683_v61 = vrot.slane %v1955_v3, 2 }
 0x1a5   : > { %vm1019_vm12 = vmand %vm2624_vm5, %vm2294_vm13  ;;  %v674_v36 = vrot.slane %v2190_v10, 2  ;;  %v745_v38 = vmul.f32 %v685_v49, %v1949_v1  ;;  %vm3250_vm10 = vcmp.lt.s32.totalorder %v2047_v35, 6  ;;  %v1199_v23 = vsub.f32 %v2104_v11, %v2101_v26 }
 0x1a6   : > { %vm3239_vm1 = vmmov %vm3236_vm11  ;;  %vm734_vm11 = vcmp.lt.s32.totalorder %v2552_v48, 32  ;;  %v1423_v28 = vsel %vm1019_vm12, 1.0, %v1716_v14  ;;  %v1033_v22 = vadd.f32 %v1030_v4, %v1029_v24 }
 0x1a7   : > { %v677_v53 = vsel %vm3239_vm1, %v672_v50, %v673_v15  ;;  %vm3240_vm6 = vmmov %vm3239_vm1  ;;  %v1031_v43 = vmul.f32 %v1423_v28, %v1952_v2 }
 0x1a8   : > { %v678_v54 = vsel %vm3240_vm6, %v671_v25, %v672_v50  ;;  %vm3241_vm14 = vmmov %vm3239_vm1  ;;  %vm2692_vm6 = vcmp.eq.s32.totalorder %v715_v33, 2  ;;  %v761_v40 = vsub.f32 %v677_v53, %v2104_v11  ;;  %v440_v53 = vpop.permute.xlu1 %439 }
 0x1a9   : > { %v686_v60 = vsel %vm3241_vm14, %v680_v18, %v681_v62  ;;  %vm741_vm1 = vmand %vm2656_vm2, %vm3242_vm15  ;;  %vm2696_vm14 = vcmp.eq.s32.totalorder %v723_v46, 0  ;;  %v760_v5 = vsub.f32 %v678_v54, %v2101_v26  ;;  %v676_v62 = vsel %vm3250_vm10, %v673_v15, %v674_v36  ;;  %v2752_v54 = vpop.permute.xlu0 %609 }
 0x1aa   : > { %vm1020_vm3 = vmand %vm2668_vm4, %vm2294_vm13  ;;  %v744_v48 = vmul.f32 %v686_v60, %v1946_v0  ;;  %v1406_v1 = vsel %vm741_vm1, 1.0, %v1716_v14  ;;  %v765_v29 = vand.u32 2147483647, %v761_v40  ;;  %v762_v46 = vsub.f32 %v676_v62, %v2127_v37  ;;  %v2759_v60 = vld [vmem:[%s1943_s17 + $0x18] sm:$0xff] }
 0x1ab   : > { %vm2713_vm2 = vmand %vm730_vm7, %vm734_vm11  ;;  %vm735_vm7 = vcmp.lt.s32.totalorder %v711_v20, 32  ;;  %v1424_v12 = vsel %vm1020_vm3, 1.0, %v1716_v14  ;;  %v757_v50 = vmul.f32 %v1406_v1, %v745_v38  ;;  %v764_v8 = vand.u32 2147483647, %v760_v5 }
 0x1ac   : > { %vm3249_vm13 = vmand %vm2640_vm8, %vm3242_vm15  ;;  %v1032_v15 = vmul.f32 %v1424_v12, %v1955_v3  ;;  %v846_v17 = vpop.permute.xlu1 %845 }
 0x1ad   : > { %v1405_v0 = vsel %vm3249_vm13, 1.0, %v1716_v14  ;;  %vm731_vm9 = vmand %vm2692_vm6, %vm2696_vm14  ;;  %v769_v3 = vmul.f32 %v765_v29, %v757_v50  ;;  %v2764_v7 = vpop.permute.xlu0 %839  ;;  %vm617_vm14 = vcmp.gt.s32.totalorder %v2002_v44, %v2536_v63  ;;  %vm443_vm13 = vcmp.gt.s32.totalorder %v2002_v44, %v440_v53 }
 0x1ae   : > { %vm3251_vm8 = vmmov %vm3250_vm10  ;;  %v756_v9 = vmul.f32 %v1405_v0, %v744_v48  ;;  %v444_v32 = vsel %vm443_vm13, %v2002_v44, %v440_v53  ;;  %vm847_vm10 = vcmp.lt.s32.totalorder %v2002_v44, %v846_v17  ;;  %vm3259_vm13 = vnez %v3176_v52 }
 0x1af   : > { %v684_v19 = vsel %vm3251_vm8, %v682_v6, %v683_v61  ;;  %vm742_vm12 = vmand %vm2713_vm2, %vm3242_vm15  ;;  %v1034_v6 = vadd.f32 %v1033_v22, %v1031_v43  ;;  %vm441_vm2 = vcmp.lt.s32.totalorder %v2002_v44, %v440_v53 }
 0x1b0   : > { %vm3252_vm11 = vmmov %vm3251_vm8  ;;  %v746_v33 = vmul.f32 %v684_v19, %v1952_v2  ;;  %v1407_v49 = vsel %vm742_vm12, 1.0, %v1716_v14  ;;  %v2767_v47 = vpop.permute.xlu1 %1077  ;;  %v618_v19 = vsel %vm617_vm14, %v2002_v44, %v2536_v63  ;;  %vm3258_vm14 = vnez %v3178_v56 }
 0x1b1   : > { %v687_v20 = vsel %vm3252_vm11, %v683_v61, %v680_v18  ;;  %vm2742_vm3 = vmand %vm731_vm9, %vm735_vm7  ;;  %v768_v18 = vmul.f32 %v764_v8, %v756_v9  ;;  %v1035_v24 = vadd.f32 %v1034_v6, %v1032_v15  ;;  %v766_v61 = vand.u32 2147483647, %v762_v46  ;;  %v2769_v0 = vpop.permute.xlu0 %611 }
 0x1b2   : > { %vm3255_vm1 = vmmov %vm3251_vm8  ;;  %v747_v2 = vmul.f32 %v2759_v60, %v687_v20  ;;  %v758_v4 = vmul.f32 %v1407_v49, %v746_v33  ;;  %v442_v20 = vsel %vm441_vm2, %v2002_v44, %v440_v53  ;;  %vm849_vm8 = vcmp.gt.s32.totalorder %v2002_v44, %v846_v17 }
 0x1b3   : > { %v679_v16 = vsel %vm3255_vm1, %v674_v36, %v671_v25  ;;  %vm743_vm6 = vmand %vm2742_vm3, %vm3242_vm15  ;;  %v772_v36 = vadd.f32 %v769_v3, %v768_v18  ;;  %vm615_vm15 = vcmp.lt.s32.totalorder %v2002_v44, %v2536_v63  ;;  %v445_v15 = vsub.s32 %v444_v32, %v442_v20 }
 0x1b4   : > { %v763_v25 = vsub.f32 %v679_v16, %v2190_v10  ;;  %v1408_v28 = vsel %vm743_vm6, 1.0, %v1716_v14  ;;  %v770_v38 = vmul.f32 %v766_v61, %v758_v4  ;;  %v432_v43 = vpop.permute.xlu1 %431  ;;  %vm624_vm11 = vcmp.lt.s32.totalorder %v618_v19, 32  ;;  %v2810_v4 = vld [vmem:[%s1943_s17 + $0x8] sm:$0xff]  ;;  %v2815_v61 = vld [vmem:[%s1943_s17] sm:$0xff] }
 0x1b5   : > { %v759_v27 = vmul.f32 %v1408_v28, %v747_v2  ;;  %v2771_v22 = vpop.permute.xlu0 %841  ;;  %vm446_vm3 = vcmp.eq.s32.totalorder %v445_v15, 1  ;;  %vm447_vm1 = vcmp.lt.s32.totalorder %v444_v32, 32  ;;  %v848_v33 = vsel %vm847_vm10, %v2002_v44, %v846_v17 }
 0x1b6   : > { %v767_v48 = vand.u32 2147483647, %v763_v25  ;;  %v773_v5 = vadd.f32 %v772_v36, %v770_v38  ;;  %v850_v46 = vsel %vm849_vm8, %v2002_v44, %v846_v17  ;;  %v853_v3 = vand.u32 3, %v848_v33 }
 0x1b7   : > { %v851_v18 = vsub.s32 %v850_v46, %v848_v33  ;;  %v450_v25 = vmul.f32 %v2810_v4, %v2554_v59  ;;  %v449_v28 = vmul.f32 %v2815_v61, %v432_v43  ;;  %vm856_vm8 = vcmp.lt.s32.totalorder %v850_v46, 32 }
 0x1b8   : > { %v771_v40 = vmul.f32 %v767_v48, %v759_v27  ;;  %v606_v12 = vpop.permute.xlu1 %605  ;;  %v2823_v27 = vld [vmem:[%s1943_s17 + $0x10] sm:$0xff]  ;;  %vm2836_vm10 = vcmp.eq.s32.totalorder %v853_v3, 0  ;;  %v452_v33 = vmul.f32 %v2759_v60, %v2724_v57 }
 0x1b9   : > { %v2777_v62 = vpop.permute.xlu0 %1071  ;;  %v451_v48 = vmul.f32 %v2823_v27, %v2596_v13  ;;  %v630_v43 = vmul.f32 %v2815_v61, %v606_v12 }
 0x1ba   : > { %v774_v1 = vadd.f32 %v773_v5, %v771_v40  ;;  %v631_v40 = vmul.f32 %v2810_v4, %v2660_v30 }
 0x1bc   : > { %1036 = vadd.xlane.f32.xlu1 %v1035_v24  ;;  %v2785_v8 = vpop.permute.xlu1 %837 }
 0x1bd   : > { %v2787_v29 = vpop.permute.xlu0 %843 }
 0x1c0   : > { %402 = vadd.xlane.f32.xlu1 %v2232_v34  ;;  %v616_v34 = vsel %vm615_vm15, %v2002_v44, %v2536_v63  ;;  %v2793_v63 = vpop.permute.xlu1 %1069  ;;  %vm448_vm15 = vmand %vm446_vm3, %vm447_vm1  ;;  %vm1079_vm3 = vcmp.lt.s32.totalorder %v2002_v44, %v2767_v47  ;;  %vm1081_vm1 = vcmp.gt.s32.totalorder %v2002_v44, %v2767_v47 }
 0x1c1   : > { %v619_v9 = vsub.s32 %v618_v19, %v616_v34  ;;  %v621_v50 = vand.u32 1, %v616_v34  ;;  %v2795_v6 = vpop.permute.xlu0 %1073  ;;  %v1396_v38 = vsel %vm448_vm15, 1.0, %v1716_v14  ;;  %vm3266_vm15 = vnez %v3184_v21 }
 0x1c2   : > { %v456_v12 = vmul.f32 %v1396_v38, %v450_v25  ;;  %v457_v3 = vmul.f32 %v1396_v38, %v451_v48  ;;  %v1052_v48 = vand.u32 7, %v2050_v39  ;;  %v458_v52 = vmul.f32 %v1396_v38, %v452_v33 }
 0x1c3   : > { %vm620_vm9 = vcmp.eq.s32.totalorder %v619_v9, 2  ;;  %vm622_vm7 = vcmp.eq.s32.totalorder %v621_v50, 0  ;;  %v455_v9 = vmul.f32 %v1396_v38, %v449_v28  ;;  %v1080_v39 = vsel %vm1079_vm3, %v2002_v44, %v2767_v47 }
 0x1c4   : > { %775 = vadd.xlane.f32.xlu1 %v774_v1  ;;  %vm623_vm12 = vmand %vm620_vm9, %vm622_vm7  ;;  %vm2832_vm7 = vcmp.eq.s32.totalorder %v851_v18, 4  ;;  %v2888_v55 = vsel %vm1081_vm1, %v2002_v44, %v2767_v47 }
 0x1c5   : > { %vm2799_vm6 = vmand %vm623_vm12, %vm624_vm11 }
 0x1c6   : > { %vm627_vm2 = vmand %vm2799_vm6, %vm3258_vm14 }
 0x1c7   : > { %vm626_vm9 = vmand %vm2799_vm6, %vm3259_vm13  ;;  %v1402_v13 = vsel %vm627_vm2, 1.0, %v1716_v14 }
 0x1c8   : > { %v1401_v34 = vsel %vm626_vm9, 1.0, %v1716_v14  ;;  %vm855_vm12 = vmand %vm2832_vm7, %vm2836_vm10  ;;  %v643_v56 = vmul.f32 %v1402_v13, %v631_v40  ;;  %vm2900_vm9 = vcmp.eq.s32.totalorder %v1052_v48, 0 }
 0x1c9   : > { %vm2856_vm11 = vmand %vm855_vm12, %vm856_vm8  ;;  %vm3274_vm8 = vnez %v3196_v41  ;;  %v633_v41 = vmul.f32 %v2759_v60, %v2769_v0 }
 0x1ca   : > { %vm628_vm14 = vmand %vm2799_vm6, %vm3266_vm15 }
 0x1cb   : > { %vm859_vm2 = vmand %vm2856_vm11, %vm2581_vm0  ;;  %vm3267_vm0 = vnez %v3222_v58 }
 0x1cc   : > { %vm858_vm13 = vmand %vm2856_vm11, %vm3267_vm0  ;;  %vm1088_vm0 = vcmp.lt.s32.totalorder %v2888_v55, 32 }
 0x1cd   : > { %vm629_vm12 = vmand %vm2799_vm6, %vm3274_vm8 }
 0x1de   : > { %v424_v49 = vpop.permute.xlu1 %423  ;;  %v426_v53 = vpop.permute.xlu0 %425 }
 0x1df   : > { %v459_v2 = vsub.f32 %v424_v49, %v2101_v26  ;;  %v460_v24 = vsub.f32 %v426_v53, %v2104_v11  ;;  %v642_v49 = vmul.f32 %v1401_v34, %v630_v43  ;;  %v1403_v43 = vsel %vm628_vm14, 1.0, %v1716_v14 }
 0x1e1   : > { %v463_v30 = vand.u32 2147483647, %v459_v2  ;;  %v464_v19 = vand.u32 2147483647, %v460_v24 }
 0x1e2   : > { %v428_v36 = vpop.permute.xlu1 %427  ;;  %v600_v17 = vpop.permute.xlu0 %599 }
 0x1e3   : > { %v461_v59 = vsub.f32 %v428_v36, %v2127_v37  ;;  %v647_v5 = vsub.f32 %v600_v17, %v2104_v11  ;;  %v467_v53 = vmul.f32 %v463_v30, %v455_v9  ;;  %v468_v18 = vmul.f32 %v464_v19, %v456_v12 }
 0x1e4   : > { %v632_v17 = vmul.f32 %v2823_v27, %v2752_v54  ;;  %v1051_v54 = vand.u32 7, %v2047_v35  ;;  %v1414_v9 = vsel %vm859_vm2, 1.0, %v1716_v14  ;;  %vm860_vm2 = vmand %vm2856_vm11, %vm2624_vm5 }
 0x1e5   : > { %v465_v20 = vand.u32 2147483647, %v461_v59  ;;  %v651_v32 = vand.u32 2147483647, %v647_v5  ;;  %v1059_v59 = vand.u32 7, %v2002_v44  ;;  %v471_v21 = vadd.f32 %v468_v18, %v467_v53 }
 0x1e6   : > { %v598_v50 = vpop.permute.xlu1 %597  ;;  %v832_v5 = vpop.permute.xlu0 %831  ;;  %v863_v44 = vmul.f32 %v2810_v4, %v2764_v7  ;;  %v644_v58 = vmul.f32 %v1403_v43, %v632_v17  ;;  %vm2912_vm10 = vcmp.eq.s32.totalorder %v1051_v54, 0  ;;  %v864_v43 = vmul.f32 %v2823_v27, %v2771_v22 }
 0x1e7   : > { %v646_v15 = vsub.f32 %v598_v50, %v2101_v26  ;;  %v469_v57 = vmul.f32 %v465_v20, %v457_v3  ;;  %v655_v28 = vmul.f32 %v651_v32, %v643_v56  ;;  %v879_v38 = vsub.f32 %v832_v5, %v2104_v11 }
 0x1e8   : > { %vm2904_vm7 = vcmp.eq.s32.totalorder %v1059_v59, 0  ;;  %v862_v50 = vmul.f32 %v2815_v61, %v2785_v8  ;;  %v1083_v32 = vsub.s32 %v2888_v55, %v1080_v39  ;;  %v1053_v56 = vand.u32 7, %v2053_v42 }
 0x1e9   : > { %v650_v2 = vand.u32 2147483647, %v646_v15  ;;  %v472_v19 = vadd.f32 %v471_v21, %v469_v57  ;;  %v1413_v15 = vsel %vm858_vm13, 1.0, %v1716_v14  ;;  %v883_v8 = vand.u32 2147483647, %v879_v38  ;;  %vm1180_vm3 = vmand %vm2900_vm9, %vm2904_vm7 }
 0x1ea   : > { %v430_v25 = vpop.permute.xlu1 %429  ;;  %v875_v3 = vmul.f32 %v1414_v9, %v863_v44  ;;  %v1184_v42 = vmul.f32 %v2823_v27, %v2810_v4  ;;  %vm1179_vm6 = vmand %vm2912_vm10, %vm2904_vm7  ;;  %vm2934_vm1 = vcmp.eq.s32.totalorder %v1083_v32, 8  ;;  %vm2941_vm15 = vcmp.eq.s32.totalorder %v1053_v56, 0  ;;  %v1064_v51 = vpop.permute.xlu0 %1063 }
 0x1eb   : > { %v654_v36 = vmul.f32 %v650_v2, %v642_v49  ;;  %v462_v46 = vsub.f32 %v430_v25, %v2190_v10  ;;  %v1085_v49 = vand.u32 7, %v1080_v39  ;;  %v874_v2 = vmul.f32 %v1413_v15, %v862_v50  ;;  %vm1181_vm13 = vmand %vm2941_vm15, %vm2904_vm7 }
 0x1ec   : > { %v887_v48 = vmul.f32 %v883_v8, %v875_v3  ;;  %v2960_v21 = vsel %vm1180_vm3, 1.0, %v1716_v14  ;;  %v1203_v44 = vand.u32 2147483647, %v1199_v23  ;;  %v1185_v15 = vmul.f32 %v2823_v27, %v2759_v60 }
 0x1ed   : > { %v658_v40 = vadd.f32 %v655_v28, %v654_v36  ;;  %v466_v1 = vand.u32 2147483647, %v462_v46  ;;  %v1404_v28 = vsel %vm629_vm12, 1.0, %v1716_v14  ;;  %v1183_v36 = vmul.f32 %v2815_v61, %v2810_v4  ;;  %vm861_vm12 = vmand %vm2856_vm11, %vm2668_vm4 }
 0x1ee   : > { %v602_v13 = vpop.permute.xlu1 %601  ;;  %vm2945_vm14 = vcmp.eq.s32.totalorder %v1085_v49, 0  ;;  %v1196_v22 = vmul.f32 %v2960_v21, %v1184_v42  ;;  %v1201_v56 = vsub.f32 %v2190_v10, %v2127_v37  ;;  %v865_v8 = vmul.f32 %v2759_v60, %v2787_v29  ;;  %v1076_v23 = vpop.permute.xlu0 %1075 }
 0x1ef   : > { %v470_v34 = vmul.f32 %v466_v1, %v458_v52  ;;  %v648_v30 = vsub.f32 %v602_v13, %v2127_v37  ;;  %v1200_v52 = vsub.f32 %v2127_v37, %v2104_v11  ;;  %v645_v1 = vmul.f32 %v1404_v28, %v633_v41  ;;  %vm1087_vm5 = vmand %vm2934_vm1, %vm2945_vm14 }
 0x1f0   : > { %v1415_v13 = vsel %vm860_vm2, 1.0, %v1716_v14  ;;  %vm2986_vm8 = vmand %vm1087_vm5, %vm1088_vm0  ;;  %v1416_v3 = vsel %vm861_vm12, 1.0, %v1716_v14  ;;  %v1054_v42 = vand.u32 7, %v2056_v45  ;;  %v1205_v57 = vand.u32 2147483647, %v1201_v56 }
 0x1f1   : > { %v652_v12 = vand.u32 2147483647, %v648_v30  ;;  %v473_v20 = vadd.f32 %v472_v19, %v470_v34  ;;  %v1186_v19 = vmul.f32 %v2815_v61, %v2759_v60  ;;  %v1204_v55 = vand.u32 2147483647, %v1200_v52  ;;  %vm1090_vm3 = vmand %vm2986_vm8, %vm2912_vm10 }
 0x1f2   : > { %v830_v33 = vpop.permute.xlu1 %829  ;;  %v876_v50 = vmul.f32 %v1415_v13, %v864_v43  ;;  %vm1091_vm4 = vmand %vm2986_vm8, %vm2900_vm9  ;;  %v1095_v45 = vmul.f32 %v2810_v4, %v2777_v62  ;;  %v1111_v28 = vsub.f32 %v1064_v51, %v2104_v11  ;;  %vm3034_vm9 = vcmp.eq.s32.totalorder %v1054_v42, 0 }
 0x1f3   : > { %v656_v53 = vmul.f32 %v652_v12, %v644_v58  ;;  %v878_v18 = vsub.f32 %v830_v33, %v2101_v26  ;;  %474 = vadd.xlane.f32.xlu0 %v473_v20  ;;  %v1431_v33 = vsel %vm1181_vm13, 1.0, %v1716_v14  ;;  %v1198_v24 = vmul.f32 0.0, %v1186_v19  ;;  %vm1092_vm11 = vmand %vm2986_vm8, %vm2941_vm15 }
 0x1f4   : > { %v1197_v47 = vmul.f32 %v1431_v33, %v1185_v15  ;;  %v1426_v46 = vsel %vm1091_vm4, 1.0, %v1716_v14  ;;  %v1427_v62 = vsel %vm1092_vm11, 1.0, %v1716_v14  ;;  %v1237_v13 = vmul.f32 %v2810_v4, %v2960_v21  ;;  %vm1093_vm10 = vmand %vm2986_vm8, %vm3034_vm9 }
 0x1f5   : > { %v882_v16 = vand.u32 2147483647, %v878_v18  ;;  %v659_v25 = vadd.f32 %v658_v40, %v656_v53  ;;  %v2963_v40 = vsel %vm1179_vm6, 1.0, %v1716_v14  ;;  %v1208_v18 = vmul.f32 %v1204_v55, %v1196_v22  ;;  %vm1227_vm6 = vmand %vm3034_vm9, %vm2904_vm7 }
 0x1f6   : > { %v604_v0 = vpop.permute.xlu1 %603  ;;  %v1195_v9 = vmul.f32 %v2963_v40, %v1183_v36  ;;  %v1236_v43 = vmul.f32 %v2815_v61, %v2963_v40  ;;  %v1097_v19 = vmul.f32 %v2759_v60, %v1076_v23  ;;  %v1238_v21 = vmul.f32 %v2823_v27, %v1431_v33 }
 0x1f7   : > { %v886_v59 = vmul.f32 %v882_v16, %v874_v2  ;;  %v649_v5 = vsub.f32 %v604_v0, %v2190_v10  ;;  %v1094_v2 = vmul.f32 %v2815_v61, %v2793_v63  ;;  %v1425_v63 = vsel %vm1090_vm3, 1.0, %v1716_v14 }
 0x1f8   : > { %v1207_v53 = vmul.f32 %v1203_v44, %v1195_v9  ;;  %v877_v0 = vmul.f32 %v1416_v3, %v865_v8  ;;  %v1240_v58 = vadd.f32 %v1237_v13, %v1236_v43  ;;  %vm412_vm7 = vcmask 0  }
 0x1f9   : > { %v890_v39 = vadd.f32 %v887_v48, %v886_v59  ;;  %v653_v54 = vand.u32 2147483647, %v649_v5  ;;  %v1106_v5 = vmul.f32 %v1425_v63, %v1094_v2  ;;  %vm414_vm1 = vcmask 8200  }
 0x1fa   : > { %v834_v38 = vpop.permute.xlu1 %833  ;;  %v1211_v17 = vadd.f32 %v1208_v18, %v1207_v53  ;;  %vm583_vm15 = vcmask 16400   ;;  %vm585_vm14 = vcmask 49200   ;;  %vm814_vm2 = vcmask 24600  }
 0x1fb   : > { %v657_v34 = vmul.f32 %v653_v54, %v645_v1  ;;  %v880_v30 = vsub.f32 %v834_v38, %v2127_v37  ;;  %v1209_v1 = vmul.f32 %v1205_v57, %v1197_v47  ;;  %v1107_v38 = vmul.f32 %v1426_v46, %v1095_v45 }
 0x1fc   : > { %vm817_vm5 = vcmask 57400   ;;  %vm1046_vm0 = vcmask 32800   ;;  %vm1049_vm13 = vcmask 65600   ;;  %vm1253_vm8 = vcmask 41000  }
 0x1fd   : > { %v884_v12 = vand.u32 2147483647, %v880_v30  ;;  %v660_v20 = vadd.f32 %v659_v25, %v657_v34  ;;  %v1202_v25 = vsub.f32 %v2101_v26, %v2190_v10  ;;  %v1212_v30 = vadd.f32 %v1211_v17, %v1209_v1 }
 0x1fe   : > { %v1062_v32 = vpop.permute.xlu1 %1061  ;;  %vm1256_vm12 = vcmask 73800  }
 0x1ff   : > { %v888_v49 = vmul.f32 %v884_v12, %v876_v50  ;;  %661 = vadd.xlane.f32.xlu0 %v660_v20  ;;  %v1110_v29 = vsub.f32 %v1062_v32, %v2101_v26  ;;  %v1096_v26 = vmul.f32 %v2823_v27, %v2795_v6  ;;  %v1206_v52 = vand.u32 2147483647, %v1202_v25 }
 0x200   : > { %v1428_v50 = vsel %vm1093_vm10, 1.0, %v1716_v14  ;;  %v1435_v12 = vsel %vm1227_vm6, 1.0, %v1716_v14  ;;  %v1241_v27 = vadd.f32 %v1240_v58, %v1238_v21 }
 0x201   : > { %v891_v41 = vadd.f32 %v890_v39, %v888_v49  ;;  %v1114_v7 = vand.u32 2147483647, %v1110_v29  ;;  %v1115_v39 = vand.u32 2147483647, %v1111_v28  ;;  %v1108_v34 = vmul.f32 %v1427_v62, %v1096_v26 }
 0x202   : > { %v836_v16 = vpop.permute.xlu1 %835  ;;  %v1210_v4 = vmul.f32 %v1206_v52, %v1198_v24  ;;  %v1109_v20 = vmul.f32 %v1428_v50, %v1097_v19  ;;  %v1239_v8 = vmul.f32 %v2759_v60, %v1435_v12 }
 0x203   : > { %v881_v36 = vsub.f32 %v836_v16, %v2190_v10  ;;  %v1118_v22 = vmul.f32 %v1114_v7, %v1106_v5  ;;  %v1119_v40 = vmul.f32 %v1115_v39, %v1107_v38 }
 0x204   : > { %v1213_v15 = vadd.f32 %v1212_v30, %v1210_v4  ;;  %v1242_v51 = vadd.f32 %v1241_v27, %v1239_v8 }
 0x205   : > { %v885_v59 = vand.u32 2147483647, %v881_v36  ;;  %v1122_v32 = vadd.f32 %v1119_v40, %v1118_v22 }
 0x206   : > { %v1066_v11 = vpop.permute.xlu1 %1065 }
 0x207   : > { %v889_v54 = vmul.f32 %v885_v59, %v877_v0  ;;  %v1112_v6 = vsub.f32 %v1066_v11, %v2127_v37 }
 0x209   : > { %v1116_v9 = vand.u32 2147483647, %v1112_v6  ;;  %v892_v61 = vadd.f32 %v891_v41, %v889_v54 }
 0x20a   : > { %v1068_v37 = vpop.permute.xlu1 %1067 }
 0x20b   : > { %v1120_v44 = vmul.f32 %v1116_v9, %v1108_v34  ;;  %v1113_v55 = vsub.f32 %v1068_v37, %v2190_v10  ;;  %893 = vadd.xlane.f32.xlu1 %v892_v61 }
 0x20d   : > { %v1117_v35 = vand.u32 2147483647, %v1113_v55  ;;  %v1123_v49 = vadd.f32 %v1122_v32, %v1120_v44 }
 0x20f   : > { %v1121_v56 = vmul.f32 %v1117_v35, %v1109_v20  ;;  %1214 = vadd.xlane.f32.xlu1 %v1213_v15 }
 0x211   : > { %v1124_v33 = vadd.f32 %v1123_v49, %v1121_v56 }
 0x213   : > { %1125 = vadd.xlane.f32.xlu0 %v1124_v33 }
 0x217   : > { %1243 = vadd.xlane.f32.xlu0 %v1242_v51 }
 0x228   : > { %v805_v41 = vpop.xlane.xlu0 %804 }
 0x229   : > { %v806_v0 = vrot.slane %v805_v41, 4 }
 0x22b   : > { %v807_v7 = vadd.f32 %v806_v0, %v805_v41 }
 0x22c   : > { %v573_v2 = vpop.xlane.xlu0 %572 }
 0x22d   : > { %v574_v16 = vrot.slane %v573_v2, 4  ;;  %v808_v43 = vrot.slane %v807_v7, 2 }
 0x22f   : > { %v575_v47 = vadd.f32 %v574_v16, %v573_v2  ;;  %v809_v30 = vadd.f32 %v808_v43, %v807_v7 }
 0x230   : > { %v1008_v25 = vpop.xlane.xlu0 %1007 }
 0x231   : > { %v576_v60 = vrot.slane %v575_v47, 2  ;;  %v1009_v6 = vrot.slane %v1008_v25, 4  ;;  %v810_v4 = vrot.slane %v809_v30, 1 }
 0x233   : > { %v577_v46 = vadd.f32 %v576_v60, %v575_v47  ;;  %v1010_v22 = vadd.f32 %v1009_v6, %v1008_v25  ;;  %v811_v12 = vadd.f32 %v810_v4, %v809_v30 }
 0x235   : > { %v578_v48 = vrot.slane %v577_v46, 1  ;;  %v1011_v40 = vrot.slane %v1010_v22, 2 }
 0x237   : > { %v579_v1 = vadd.f32 %v578_v48, %v577_v46  ;;  %v1012_v35 = vadd.f32 %v1011_v40, %v1010_v22 }
 0x239   : > { %v1013_v51 = vrot.slane %v1012_v35, 1 }
 0x23b   : > { %v1014_v41 = vadd.f32 %v1013_v51, %v1012_v35 }
 0x249   : > { %v1037_v10 = vpop.xlane.xlu1 %1036 }
 0x24a   : > { %v1038_v38 = vrot.slane %v1037_v10, 4 }
 0x24c   : > { %v1039_v61 = vadd.f32 %v1038_v38, %v1037_v10 }
 0x24d   : > { %v403_v24 = vpop.xlane.xlu1 %402 }
 0x24e   : > { %v404_v53 = vrot.slane %v403_v24, 4  ;;  %v1040_v58 = vrot.slane %v1039_v61, 2 }
 0x250   : > { %v405_v18 = vadd.f32 %v404_v53, %v403_v24  ;;  %v1041_v49 = vadd.f32 %v1040_v58, %v1039_v61 }
 0x251   : > { %v776_v45 = vpop.xlane.xlu1 %775 }
 0x252   : > { %v406_v3 = vrot.slane %v405_v18, 2  ;;  %v777_v36 = vrot.slane %v776_v45, 4 }
 0x254   : > { %v407_v14 = vadd.f32 %v406_v3, %v405_v18  ;;  %v778_v62 = vadd.f32 %v777_v36, %v776_v45  ;;  %v1042_v18 = vrot.slane %v1041_v49, 1 }
 0x256   : > { %v408_v42 = vrot.slane %v407_v14, 1  ;;  %v779_v23 = vrot.slane %v778_v62, 2  ;;  %v1043_v47 = vadd.f32 %v1042_v18, %v1041_v49 }
 0x258   : > { %v409_v29 = vadd.f32 %v408_v42, %v407_v14  ;;  %v780_v13 = vadd.f32 %v779_v23, %v778_v62 }
 0x25a   : > { %1452 = vpush %v409_v29  ;;  %v781_v9 = vrot.slane %v780_v13, 1 }
 0x25c   : > { %v782_v55 = vadd.f32 %v781_v9, %v780_v13 }
 0x280   : > { %v475_v57 = vpop.xlane.xlu0 %474 }
 0x281   : > { %v476_v63 = vrot.slane %v475_v57, 4 }
 0x283   : > { %v477_v28 = vadd.f32 %v476_v63, %v475_v57 }
 0x285   : > { %v478_v26 = vrot.slane %v477_v28, 2 }
 0x287   : > { %v479_v17 = vadd.f32 %v478_v26, %v477_v28 }
 0x289   : > { %v480_v59 = vrot.slane %v479_v17, 1 }
 0x28b   : > { %s1453_s19 = spop %1452  ;;  %v481_v5 = vadd.f32 %v480_v59, %v479_v17 }
 0x28c   : > { %v411_v11 = vstv %s1453_s19  ;;  %v662_v52 = vpop.xlane.xlu0 %661  ;;  %s1635_s19 = scalar_lea.vmem %s3077_s6, 16 }
 0x28d   : > { %413 = vst.msk [vmem:[%s3058_s20] sm:$0x1] %vm412_vm7, %v411_v11  ;;  %v663_v39 = vrot.slane %v662_v52, 4  ;;  %p1636_p13 = scmp.ne.s32.totalorder %s3077_s6, %s1635_s19 }
 0x28e   : > { %1454 = vpush %v481_v5 }
 0x28f   : > { %415 = vst.msk [vmem:[%s3058_s20] sm:$0x1] %vm414_vm1, %v2042_v31  ;;  %v664_v54 = vadd.f32 %v663_v39, %v662_v52  ;;  %p1637_p6 = pnand %p1636_p13, %p3285_p7 }
 0x290   : > { %1456 = vpush %v579_v1 }
 0x291   : > { %v665_v34 = vrot.slane %v664_v54, 2  ;;  %p1638_p9 = pneg %p1637_p6 }
 0x293   : > { %v666_v19 = vadd.f32 %v665_v34, %v664_v54 }
 0x295   : > { %v667_v37 = vrot.slane %v666_v19, 1 }
 0x297   : > { %v668_v21 = vadd.f32 %v667_v37, %v666_v19 }
 0x298   : > { %v894_v44 = vpop.xlane.xlu1 %893 }
 0x299   : > { %v895_v50 = vrot.slane %v894_v44, 4  ;;  %1458 = vpush %v668_v21 }
 0x29a   : > { %1460 = vpush %v782_v55 }
 0x29b   : > { %v896_v20 = vadd.f32 %v895_v50, %v894_v44  ;;  %1462 = vpush %v811_v12 }
 0x29c   : > { %v1215_v32 = vpop.xlane.xlu1 %1214 }
 0x29d   : > { %v897_v15 = vrot.slane %v896_v20, 2  ;;  %v1216_v56 = vrot.slane %v1215_v32, 4 }
 0x29f   : > { %v1217_v8 = vadd.f32 %v1216_v56, %v1215_v32  ;;  %v898_v27 = vadd.f32 %v897_v15, %v896_v20 }
 0x2a0   : > { %v1126_v33 = vpop.xlane.xlu0 %1125 }
 0x2a1   : > { %v1218_v10 = vrot.slane %v1217_v8, 2  ;;  %v1127_v24 = vrot.slane %v1126_v33, 4  ;;  %v899_v53 = vrot.slane %v898_v27, 1 }
 0x2a3   : > { %v1128_v3 = vadd.f32 %v1127_v24, %v1126_v33  ;;  %v900_v14 = vadd.f32 %v899_v53, %v898_v27  ;;  %v1219_v42 = vadd.f32 %v1218_v10, %v1217_v8 }
 0x2a4   : > { %v1244_v29 = vpop.xlane.xlu0 %1243 }
 0x2a5   : > { %v1129_v2 = vrot.slane %v1128_v3, 2  ;;  %v1245_v16 = vrot.slane %v1244_v29, 4  ;;  %1464 = vpush %v900_v14  ;;  %v1220_v57 = vrot.slane %v1219_v42, 1 }
 0x2a6   : > { %1466 = vpush %v1014_v41 }
 0x2a7   : > { %v1246_v25 = vadd.f32 %v1245_v16, %v1244_v29  ;;  %1468 = vpush %v1043_v47  ;;  %v1130_v60 = vadd.f32 %v1129_v2, %v1128_v3  ;;  %v1221_v46 = vadd.f32 %v1220_v57, %v1219_v42 }
 0x2a9   : > { %v1247_v45 = vrot.slane %v1246_v25, 2  ;;  %v1131_v63 = vrot.slane %v1130_v60, 1 }
 0x2ab   : > { %v1248_v28 = vadd.f32 %v1247_v45, %v1246_v25  ;;  %v1132_v36 = vadd.f32 %v1131_v63, %v1130_v60 }
 0x2ad   : > { %1470 = vpush %v1132_v36  ;;  %v1249_v0 = vrot.slane %v1248_v28, 1 }
 0x2ae   : > { %1472 = vpush %v1221_v46 }
 0x2af   : > { %v1250_v26 = vadd.f32 %v1249_v0, %v1248_v28 }
 0x2b1   : > { %1474 = vpush %v1250_v26 }
 0x2bf   : > { %s1455_s25 = spop %1454 }
 0x2c0   : > { %v483_v17 = vstv %s1455_s25  ;;  %s1717_s25 = smov [#allocation8]  }
 0x2c1   : > { %s1457_s9 = spop %1456 }
 0x2c2   : > { %v581_v62 = vstv %s1457_s9  ;;  %s1639_s9 = sshll.u32 %s1717_s25, 4  ;;  %s1640_s9 = int_to_ptr.vmem [resolvable:$false] %s1639_s9 }
 0x2c3   : > { %v582_v48 = vadd.f32 %v581_v62, %v483_v17  ;;  %p1642_p12 = scmp.lt.s32.totalorder %s3077_s6, %s1640_s9 }
 0x2c5   : > { %584 = vst.msk [vmem:[%s3058_s20] sm:$0x1] %vm583_vm15, %v582_v48 }
 0x2c6   : > { %586 = vst.msk [vmem:[%s3058_s20] sm:$0x1] %vm585_vm14, %v2042_v31 }
 0x2ca   : > { %s1459_s30 = spop %1458 }
 0x2cb   : > { %v670_v7 = vstv %s1459_s30  ;;  %s1461_s28 = spop %1460  ;;  %s1641_s30 = scalar_lea.vmem %s1640_s9, 32 }
 0x2cc   : > { %v784_v59 = vstv %s1461_s28  ;;  %s1463_s8 = spop %1462  ;;  %p1643_p0 = scmp.lt.s32.totalorder %s1641_s30, %s1635_s19 }
 0x2cd   : > { %v813_v5 = vadd.f32 %v784_v59, %v670_v7  ;;  %v816_v23 = vstv %s1463_s8 }
 0x2ce   : > { %p1644_p8 = por %p1643_p0, %p1642_p12 }
 0x2cf   : > { %815 = vst.msk [vmem:[%s3058_s20] sm:$0x1] %vm814_vm2, %v813_v5 }
 0x2d0   : > { %818 = vst.msk [vmem:[%s3058_s20] sm:$0x1] %vm817_vm5, %v816_v23  ;;  %p1645_p10 = pnand %p1644_p8, %p1638_p9 }
 0x2d6   : > { %s1465_s29 = spop %1464 }
 0x2d7   : > { %v902_v11 = vstv %s1465_s29  ;;  %s1467_s17 = spop %1466 }
 0x2d8   : > { %v1016_v52 = vstv %s1467_s17  ;;  %s1469_s22 = spop %1468 }
 0x2d9   : > { %v1045_v31 = vadd.f32 %v1016_v52, %v902_v11  ;;  %v1048_v1 = vstv %s1469_s22 }
 0x2db   : > { %1047 = vst.msk [vmem:[%s3058_s20] sm:$0x1] %vm1046_vm0, %v1045_v31 }
 0x2dc   : > { %1050 = vst.msk [vmem:[%s3058_s20] sm:$0x1] %vm1049_vm13, %v1048_v1 }
 0x2de   : > { %s1471_s7 = spop %1470 }
 0x2df   : > { %v1134_v43 = vstv %s1471_s7  ;;  %s1473_s11 = spop %1472 }
 0x2e0   : > { %v1223_v39 = vstv %s1473_s11 }
 0x2e1   : > { %v1252_v54 = vadd.f32 %v1223_v39, %v1134_v43 }
 0x2e2   : > { %s1475_s0 = spop %1474 }
 0x2e3   : > { %v1255_v6 = vstv %s1475_s0  ;;  %1254 = vst.msk [vmem:[%s3058_s20] sm:$0x1] %vm1253_vm8, %v1252_v54 }
 0x2e4   : > { %1257 = vst.msk [vmem:[%s3058_s20] sm:$0x1] %vm1256_vm12, %v1255_v6 }
 0x2e5   : > { %1648 = shalt.err (!%p1645_p10)
}
 0x2e6   : > { %s1649_s10 = scalar_lea.hbm %s3075_s27, 16  ;;  %s1653_s8 = scalar_lea.hbm %s3124_s3, 32 }
 0x2e7   : > { %p1650_p11 = scmp.ne.s32.totalorder %s3075_s27, %s1649_s10  ;;  %p1654_p5 = scmp.lt.u32.totalorder %s3075_s27, %s3124_s3 }
 0x2e8   : > { %p1655_p2 = scmp.lt.u32.totalorder %s1653_s8, %s1649_s10  ;;  %p1657_p13 = scmp.lt.u32.totalorder %s1649_s10, %s3075_s27 }
 0x2e9   : > { %p1651_p4 = pnand %p1650_p11, %p3285_p7 }
 0x2ea   : > { %p1656_p1 = por %p1655_p2, %p1654_p5 }
 0x2eb   : > { %p1652_p3 = pneg %p1651_p4 }
 0x2ec   : > { %p1658_p6 = por %p1657_p13, %p1656_p1 }
 0x2ee   : > { %p1659_p9 = pnand %p1658_p6, %p1652_p3 }
 0x2f0   : > { %1662 = shalt.err (!%p1659_p9)
}
 0x2f1   : > { %1482 = dma.vmem_to_hbm [thread:$0]  (%p3285_p7), %s3077_s6, 16, %s3075_s27, %s1259_s16  }
 0x2f2 PF: > { %s1283_s22 = sand.u32 1, %s1693_s12   ;;  %p3286_p12 = scmp.ne.s32.totalorder %s3145_s24, 0 }
 0x2f3   : > { %p3287_p0 = scmp.ge.s32.totalorder %s1705_s15, 2  ;;  %s1284_s7 = scalar_lea.sflag [#allocation4], %s1283_s22 }
 0x2f5   : > { %p1495_p8 = pnand %p3287_p0, %p3286_p12 }
 0x2f7   : > { %1688 = dma.done.wait (!%p1495_p8), %s1284_s7, 16  }
 0x2f8   : > { %1690 = vsyncadd (!%p1495_p8), %s1284_s7, 4294967280  ;;  %p19_p10 = scmp.ge.s32.totalorder %s1763_s18, 4   ;;  %s3288_s12 = smov %s1697_s13 }
 0x2f9   : > { %s3289_s13 = smov %s1701_s14  ;;  %s3290_s14 = smov %s1775_s21 }
 0x2fa   : > { %s3291_s15 = smov %s1763_s18  ;;  %21 = sbr.rel (!%p19_p10) target bundleno = 9 (0x9), region = 101 }
 0x301   :  { %1288 = vsyncpa [#allocation3], 1 }
 0x302   :  { %1290 = vsyncpa [#allocation3 + $0x1], 1 }
 0x303   :  { %1291 = vsyncpa [#allocation6], 1 }
 0x304   :  { %1293 = vsyncpa [#allocation6 + $0x1], 1 }
 0x305   :  { %1294 = vsyncpa [#allocation4], 1 }
 0x306   :  { %1296 = vsyncpa [#allocation4 + $0x1], 1 }

</bundles_post_ra>
